<compile_context>
chip_gen: v6e
topology: v6e:2x2x1
jax: 0.10.0
libtpu: 0.0.40
codegen_flags: <defaults>
</compile_context>

<pallas_src>
import jax
import jax.numpy as jnp
import numpy as np
from jax.experimental import pallas as pl
from jax.experimental.pallas import tpu as pltpu


def bilstm_kernel(emb_ref, len_ref, wih_ref, whh_ref, b_ref, out_ref, hn_ref):
    """Fused bidirectional LSTM over packed (length-masked) sequences.

    emb_ref : (T, tileB, E)  f32  time-major embeddings for one batch tile
    len_ref : (tileB, 1)     i32  valid lengths (0 for padded batch rows)
    wih_ref : (E, 8H)        bf16 input weights, gate-major / direction-minor cols
                                  [i_f,i_b, f_f,f_b, g_f,g_b, o_f,o_b]
    whh_ref : (2H, 8H)       bf16 block-diagonal recurrent weights over [h_f | h_b]
    b_ref   : (1, 8H)        f32  folded bias (b_ih + b_hh), same column order
    out_ref : (tileB, T*2H)  f32  columns [t*2H:(t+1)*2H] = [h_f(t) | h_b(t)], 0 at pad
    hn_ref  : (tileB, 2H)    f32  final hidden state [h_f_final | h_b_final] (sent_emb)
    """
    T, TB, E = emb_ref.shape
    G = wih_ref.shape[1]                 # 8H
    H = G // 8
    H2 = 2 * H

    lens = len_ref[...]                  # (TB, 1) int32
    whh = whh_ref[...]                   # (2H, 8H) bf16, hoisted load
    bias = b_ref[...]                    # (1, 8H)  f32

    # Hoisted input projection: ONE bf16 MXU matmul for all timesteps and both
    # directions (f32 accumulate), bias folded in -> off the serial critical path.
    emb = emb_ref[...].reshape(T * TB, E).astype(jnp.bfloat16)
    xproj = (jnp.dot(emb, wih_ref[...], preferred_element_type=jnp.float32)
             + bias).reshape(T, TB, G)

    # Lane masks / activation constants, built once (hoisted out of the loop).
    lane_g = jax.lax.broadcasted_iota(jnp.int32, (TB, G), 1)
    is_g_gate = (lane_g >= 4 * H) & (lane_g < 6 * H)      # cell-candidate (tanh) lanes
    gate_scale = jnp.where(is_g_gate, 1.0, 0.5)           # sigmoid(x)=0.5*tanh(x/2)+0.5
    gate_shift = jnp.where(is_g_gate, 0.0, 0.5)
    fwd_cols = (lane_g % H2) < H                           # fwd half of each gate block

    lane_s = jax.lax.broadcasted_iota(jnp.int32, (TB, H2), 1)
    lane_is_fwd = lane_s < H
    lens_2h = jnp.broadcast_to(lens, (TB, H2))
    lens_h = jnp.broadcast_to(lens, (TB, H))

    h = jnp.zeros((TB, H2), jnp.float32)                   # combined state [h_f | h_b]
    c = jnp.zeros((TB, H2), jnp.float32)

    # Forward step tf=s and backward step tb=T-1-s are driven together by a single
    # (TB,2H)x(2H,8H) bf16 MXU matmul per step (128 gate lanes).
    # TODO(synk): for large T (>~16) switch to lax.fori_loop(unroll=2-4) to bound
    # vreg live ranges; fully-unrolled is fine at WORDS_NUM ~ 8.
    for s in range(T):
        tf = s
        tb = T - 1 - s
        pre = jnp.where(fwd_cols, xproj[tf], xproj[tb])    # per-lane input term
        g = pre + jnp.dot(h.astype(jnp.bfloat16), whh,
                          preferred_element_type=jnp.float32)

        # Single full-width tanh; sigmoid lanes recovered with scale/shift (VPU).
        act = gate_scale * jnp.tanh(g * gate_scale) + gate_shift
        i_g = act[:, 0 * H2:1 * H2]                        # [i_f | i_b]
        f_g = act[:, 1 * H2:2 * H2]                        # [f_f | f_b]
        g_g = act[:, 2 * H2:3 * H2]                        # [g_f | g_b]
        o_g = act[:, 3 * H2:4 * H2]                        # [o_f | o_b]
        c_new = f_g * c + i_g * g_g
        h_new = o_g * jnp.tanh(c_new)

        # Packed-sequence masking: freeze state past each caption's length
        # (fwd lanes gate on tf, bwd lanes gate on tb).
        step_t = jnp.where(lane_is_fwd, tf, tb)
        m = lens_2h > step_t
        h = jnp.where(m, h_new, h)
        c = jnp.where(m, c_new, c)

        # Per-step static-slice stores into the lane-dense VMEM output block
        # (padded positions stay zero, as pad_packed_sequence produces).
        out_ref[:, tf * H2:tf * H2 + H] = jnp.where(lens_h > tf, h[:, 0:H], 0.0)
        out_ref[:, tb * H2 + H:(tb + 1) * H2] = jnp.where(lens_h > tb, h[:, H:H2], 0.0)

    hn_ref[...] = h                                        # sent_emb = [h_f_n | h_b_n]


def _interleave_gate_cols(a_f, a_b, H):
    """(R,4H),(R,4H) -> (R,8H) columns ordered [i_f,i_b,f_f,f_b,g_f,g_b,o_f,o_b]."""
    R = a_f.shape[0]
    return jnp.concatenate(
        [a_f.reshape(R, 4, H), a_b.reshape(R, 4, H)], axis=-1).reshape(R, 8 * H)


def pack_params(params):
    """One-time packing of per-direction LSTM weights into the fused kernel layout."""
    H = params["w_hh_fwd"].shape[0]
    w_ih_c = _interleave_gate_cols(params["w_ih_fwd"], params["w_ih_bwd"], H)
    b_c = _interleave_gate_cols(params["b_fwd"], params["b_bwd"], H)
    zeros_h = jnp.zeros((H, 4 * H), jnp.float32)
    w_hh_c = jnp.concatenate(
        [_interleave_gate_cols(params["w_hh_fwd"], zeros_h, H),
         _interleave_gate_cols(zeros_h, params["w_hh_bwd"], H)], axis=0)
    return {
        "emb_table": params["emb_table"].astype(jnp.float32),
        "w_ih_c": w_ih_c.astype(jnp.bfloat16),   # bf16 MXU operands (f32 accumulate)
        "w_hh_c": w_hh_c.astype(jnp.bfloat16),
        "b_c": b_c.astype(jnp.float32),
    }


def rnn_encoder_forward(captions, cap_lens, packed, *, tile_b=8):
    """Pure-JAX glue + Pallas hot path.  Returns (words_emb, sent_emb)."""
    emb_table = packed["emb_table"]
    w_ih_c = packed["w_ih_c"]
    w_hh_c = packed["w_hh_c"]
    b_c = packed["b_c"]

    B, T = captions.shape
    E = emb_table.shape[1]
    H = w_hh_c.shape[0] // 2
    H2 = 2 * H
    G = 8 * H

    # Pad batch to a sublane-aligned tile multiple; padded rows get length 0
    # (state stays zero, outputs zero) and are sliced away below.
    B_pad = ((B + tile_b - 1) // tile_b) * tile_b
    pad_b = B_pad - B

    # Embedding lookup + (eval-mode) dropout: plain-JAX glue.
    emb = jnp.take(emb_table, captions, axis=0).astype(jnp.float32)   # (B, T, E)
    emb = jnp.pad(emb, ((0, pad_b), (0, 0), (0, 0)))
    emb_tm = jnp.transpose(emb, (1, 0, 2))                            # (T, B_pad, E)
    lens = jnp.pad(cap_lens.astype(jnp.int32), (0, pad_b)).reshape(B_pad, 1)

    grid = (B_pad // tile_b,)
    out_flat, h_n = pl.pallas_call(
        bilstm_kernel,
        out_shape=(
            jax.ShapeDtypeStruct((B_pad, T * H2), jnp.float32),
            jax.ShapeDtypeStruct((B_pad, H2), jnp.float32),
        ),
        grid_spec=pltpu.PrefetchScalarGridSpec(
            num_scalar_prefetch=0,
            grid=grid,
            in_specs=[
                pl.BlockSpec((T, tile_b, E), lambda i: (0, i, 0)),   # emb, batch-tiled
                pl.BlockSpec((tile_b, 1), lambda i: (i, 0)),         # lens
                pl.BlockSpec((E, G), lambda i: (0, 0)),              # W_ih (shared)
                pl.BlockSpec((H2, G), lambda i: (0, 0)),             # W_hh (shared)
                pl.BlockSpec((1, G), lambda i: (0, 0)),              # bias (shared)
            ],
            out_specs=(
                pl.BlockSpec((tile_b, T * H2), lambda i: (i, 0)),    # padded output
                pl.BlockSpec((tile_b, H2), lambda i: (i, 0)),        # final hidden
            ),
        ),
        compiler_params=pltpu.CompilerParams(
            dimension_semantics=("parallel",),       # batch tiles are independent
            vmem_limit_bytes=32 * 1024 * 1024,
        ),
    )(emb_tm, lens, w_ih_c, w_hh_c, b_c)

    output = out_flat[:B].reshape(B, T, H2)           # (B, T, 2H): [fwd | bwd] per step
    words_emb = jnp.transpose(output, (0, 2, 1))      # (B, 2H, T)
    sent_emb = h_n[:B]                                # (B, 2H)
    return words_emb, sent_emb


def init_params(key, ntoken, ninput, nhidden_total):
    """Deterministic parameter init matching the PyTorch module's shapes."""
    H = nhidden_total // 2                            # per-direction hidden
    stdv = 1.0 / jnp.sqrt(jnp.float32(H))
    keys = jax.random.split(key, 9)

    def u(k, shape, scale):
        return jax.random.uniform(k, shape, jnp.float32, -scale, scale)

    return {
        "emb_table": u(keys[0], (ntoken, ninput), 0.1),
        # forward direction (gate order [i, f, g, o], bias = b_ih + b_hh)
        "w_ih_fwd": u(keys[1], (ninput, 4 * H), stdv),
        "w_hh_fwd": u(keys[2], (H, 4 * H), stdv),
        "b_fwd":    u(keys[3], (1, 4 * H), stdv) + u(keys[4], (1, 4 * H), stdv),
        # backward direction
        "w_ih_bwd": u(keys[5], (ninput, 4 * H), stdv),
        "w_hh_bwd": u(keys[6], (H, 4 * H), stdv),
        "b_bwd":    u(keys[7], (1, 4 * H), stdv) + u(keys[8], (1, 4 * H), stdv),
    }


def _lstm_reference(emb, lens, w_ih, w_hh, b, H, reverse=False):
    """Plain-JAX packed-LSTM reference (one direction, Precision.HIGHEST)."""
    B, T, _ = emb.shape
    h = jnp.zeros((B, H), jnp.float32)
    c = jnp.zeros((B, H), jnp.float32)
    outs = [None] * T
    order = range(T - 1, -1, -1) if reverse else range(T)
    hi = jax.lax.Precision.HIGHEST
    for t in order:
        x = emb[:, t, :]
        g = jnp.dot(x, w_ih, precision=hi) + jnp.dot(h, w_hh, precision=hi) + b
        i = jax.nn.sigmoid(g[:, 0:H])
        f = jax.nn.sigmoid(g[:, H:2 * H])
        gg = jnp.tanh(g[:, 2 * H:3 * H])
        o = jax.nn.sigmoid(g[:, 3 * H:4 * H])
        c_new = f * c + i * gg
        h_new = o * jnp.tanh(c_new)
        m = (lens > t)[:, None]
        h = jnp.where(m, h_new, h)
        c = jnp.where(m, c_new, c)
        outs[t] = jnp.where(m, h, 0.0)
    return jnp.stack(outs, axis=1), h


if __name__ == "__main__":
    # Small shapes consistent with the module:
    #   ntoken=50 (vocab), WORDS_NUM=T=8, ninput=E=32, nhidden=32 -> per-direction H=16.
    ntoken, T, E, nhidden = 50, 8, 32, 32
    B = 2

    key = jax.random.PRNGKey(0)
    k_param, k_cap = jax.random.split(key)
    params = init_params(k_param, ntoken, E, nhidden)
    packed = pack_params(params)                    # weight packing done once

    captions = jax.random.randint(k_cap, (B, T), 0, ntoken, dtype=jnp.int32)
    cap_lens = jnp.array([8, 5], dtype=jnp.int32)   # descending (pack_padded_sequence)

    fwd = jax.jit(rnn_encoder_forward)
    words_emb, sent_emb = fwd(captions, cap_lens, packed)
    jax.block_until_ready((words_emb, sent_emb))

    assert words_emb.shape == (B, nhidden, T)       # (B, 2H, T)
    assert sent_emb.shape == (B, nhidden)           # (B, 2H)

    # Correctness check against a plain-JAX packed BiLSTM reference (f32 HIGHEST).
    # Kernel deliberately uses bf16 MXU operands -> slightly looser tolerance.
    H = nhidden // 2
    emb_ref = jnp.take(params["emb_table"], captions, axis=0)
    out_f, h_f = _lstm_reference(emb_ref, cap_lens, params["w_ih_fwd"],
                                 params["w_hh_fwd"], params["b_fwd"], H)
    out_b, h_b = _lstm_reference(emb_ref, cap_lens, params["w_ih_bwd"],
                                 params["w_hh_bwd"], params["b_bwd"], H, reverse=True)
    words_ref = jnp.transpose(jnp.concatenate([out_f, out_b], axis=-1), (0, 2, 1))
    sent_ref = jnp.concatenate([h_f, h_b], axis=-1)
    np.testing.assert_allclose(np.asarray(words_emb), np.asarray(words_ref),
                               rtol=1e-2, atol=1e-2)
    np.testing.assert_allclose(np.asarray(sent_emb), np.asarray(sent_ref),
                               rtol=1e-2, atol=1e-2)

    print("KERNEL_OK")
</pallas_src>

<mosaic_0001>
module attributes {stable_mosaic.version = 11 : i64} {
  func.func @bilstm_kernel(%arg0: i32, %arg1: memref<8x8x32xf32, #tpu.memory_space<vmem>>, %arg2: memref<8x1xi32, #tpu.memory_space<vmem>>, %arg3: memref<32x128xbf16, #tpu.memory_space<vmem>>, %arg4: memref<32x128xbf16, #tpu.memory_space<vmem>>, %arg5: memref<1x128xf32, #tpu.memory_space<vmem>>, %arg6: memref<8x256xf32, #tpu.memory_space<vmem>>, %arg7: memref<8x32xf32, #tpu.memory_space<vmem>>) attributes {dimension_semantics = [#tpu.dimension_semantics<parallel>], iteration_bounds = array<i64: 1>, scalar_prefetch = 0 : i64, scratch_operands = 0 : i64, tpu.core_type = #tpu.core_type<tc>, window_params = [{transform_indices = @transform_0, window_bounds = array<i64: 8, 8, 32>}, {transform_indices = @transform_1, window_bounds = array<i64: 8, 1>}, {pipeline_mode = #tpu.pipeline_mode<synchronous>, transform_indices = @transform_2, window_bounds = array<i64: 32, 128>}, {pipeline_mode = #tpu.pipeline_mode<synchronous>, transform_indices = @transform_3, window_bounds = array<i64: 32, 128>}, {pipeline_mode = #tpu.pipeline_mode<synchronous>, transform_indices = @transform_4, window_bounds = array<i64: 1, 128>}, {transform_indices = @transform_5, window_bounds = array<i64: 8, 256>}, {transform_indices = @transform_6, window_bounds = array<i64: 8, 32>}]} {
    %c0 = arith.constant 0 : index
    %c0_0 = arith.constant 0 : index
    %0 = vector.load %arg2[%c0, %c0_0] : memref<8x1xi32, #tpu.memory_space<vmem>>, vector<8x1xi32>
    %c0_1 = arith.constant 0 : index
    %c0_2 = arith.constant 0 : index
    %1 = vector.load %arg4[%c0_1, %c0_2] : memref<32x128xbf16, #tpu.memory_space<vmem>>, vector<32x128xbf16>
    %c0_3 = arith.constant 0 : index
    %c0_4 = arith.constant 0 : index
    %2 = vector.load %arg5[%c0_3, %c0_4] : memref<1x128xf32, #tpu.memory_space<vmem>>, vector<1x128xf32>
    %c0_5 = arith.constant 0 : index
    %c0_6 = arith.constant 0 : index
    %c0_7 = arith.constant 0 : index
    %3 = vector.load %arg1[%c0_5, %c0_6, %c0_7] : memref<8x8x32xf32, #tpu.memory_space<vmem>>, vector<8x8x32xf32>
    %4 = vector.shape_cast %3 : vector<8x8x32xf32> to vector<64x32xf32>
    %5 = arith.truncf %4 : vector<64x32xf32> to vector<64x32xbf16>
    %c0_8 = arith.constant 0 : index
    %c0_9 = arith.constant 0 : index
    %6 = vector.load %arg3[%c0_8, %c0_9] : memref<32x128xbf16, #tpu.memory_space<vmem>>, vector<32x128xbf16>
    %cst = arith.constant dense<0.000000e+00> : vector<64x128xf32>
    %7 = tpu.matmul %5, %6, %cst {dimension_numbers = #tpu.dot_dimension_numbers<[1], [0], [0], [1], [0, 0, 1, 1], [], []>} : vector<64x32xbf16>, vector<32x128xbf16>, vector<64x128xf32> -> vector<64x128xf32>
    %8 = vector.broadcast %2 : vector<1x128xf32> to vector<64x128xf32>
    %9 = arith.addf %7, %8 : vector<64x128xf32>
    %10 = vector.shape_cast %9 : vector<64x128xf32> to vector<8x8x128xf32>
    %11 = tpu.iota {dimensions = array<i32: 1>} : vector<8x128xi32>
    %c64_i32 = arith.constant 64 : i32
    %12 = vector.broadcast %c64_i32 : i32 to vector<8x128xi32>
    %13 = arith.cmpi sge, %11, %12 : vector<8x128xi32>
    %c96_i32 = arith.constant 96 : i32
    %14 = vector.broadcast %c96_i32 : i32 to vector<8x128xi32>
    %15 = arith.cmpi slt, %11, %14 : vector<8x128xi32>
    %16 = arith.andi %13, %15 : vector<8x128xi1>
    %cst_10 = arith.constant 1.000000e+00 : f32
    %cst_11 = arith.constant 5.000000e-01 : f32
    %17 = vector.broadcast %cst_10 : f32 to vector<8x128xf32>
    %18 = vector.broadcast %cst_11 : f32 to vector<8x128xf32>
    %19 = arith.select %16, %17, %18 : vector<8x128xi1>, vector<8x128xf32>
    %cst_12 = arith.constant 0.000000e+00 : f32
    %cst_13 = arith.constant 5.000000e-01 : f32
    %20 = vector.broadcast %cst_12 : f32 to vector<8x128xf32>
    %21 = vector.broadcast %cst_13 : f32 to vector<8x128xf32>
    %22 = arith.select %16, %20, %21 : vector<8x128xi1>, vector<8x128xf32>
    %c32_i32 = arith.constant 32 : i32
    %c0_i32 = arith.constant 0 : i32
    %23 = arith.cmpi eq, %c32_i32, %c0_i32 : i32
    %c1_i32 = arith.constant 1 : i32
    %24 = arith.select %23, %c1_i32, %c32_i32 : i32
    %25 = vector.broadcast %24 : i32 to vector<8x128xi32>
    %26 = arith.remsi %11, %25 : vector<8x128xi32>
    %c0_i32_14 = arith.constant 0 : i32
    %27 = vector.broadcast %c0_i32_14 : i32 to vector<8x128xi32>
    %28 = arith.cmpi ne, %26, %27 : vector<8x128xi32>
    %c0_i32_15 = arith.constant 0 : i32
    %29 = vector.broadcast %c0_i32_15 : i32 to vector<8x128xi32>
    %30 = arith.cmpi slt, %26, %29 : vector<8x128xi32>
    %c0_i32_16 = arith.constant 0 : i32
    %31 = arith.cmpi slt, %24, %c0_i32_16 : i32
    %32 = vector.broadcast %31 : i1 to vector<8x128xi1>
    %33 = vector.broadcast %32 : vector<8x128xi1> to vector<8x128xi1>
    %34 = arith.xori %30, %33 : vector<8x128xi1>
    %35 = arith.andi %34, %28 : vector<8x128xi1>
    %36 = vector.broadcast %24 : i32 to vector<8x128xi32>
    %37 = arith.addi %26, %36 : vector<8x128xi32>
    %38 = arith.select %35, %37, %26 : vector<8x128xi1>, vector<8x128xi32>
    %c16_i32 = arith.constant 16 : i32
    %39 = vector.broadcast %c16_i32 : i32 to vector<8x128xi32>
    %40 = arith.cmpi slt, %38, %39 : vector<8x128xi32>
    %41 = tpu.iota {dimensions = array<i32: 1>} : vector<8x32xi32>
    %c16_i32_17 = arith.constant 16 : i32
    %42 = vector.broadcast %c16_i32_17 : i32 to vector<8x32xi32>
    %43 = arith.cmpi slt, %41, %42 : vector<8x32xi32>
    %44 = vector.shape_cast %0 : vector<8x1xi32> to vector<8x1xi32>
    %45 = vector.broadcast %44 : vector<8x1xi32> to vector<8x32xi32>
    %46 = vector.shape_cast %0 : vector<8x1xi32> to vector<8x1xi32>
    %47 = vector.broadcast %46 : vector<8x1xi32> to vector<8x16xi32>
    %cst_18 = arith.constant 0.000000e+00 : f32
    %48 = vector.broadcast %cst_18 : f32 to vector<8x32xf32>
    %cst_19 = arith.constant 0.000000e+00 : f32
    %49 = vector.broadcast %cst_19 : f32 to vector<8x32xf32>
    %50 = vector.extract_strided_slice %10 {offsets = [0, 0, 0], sizes = [1, 8, 128], strides = [1, 1, 1]} : vector<8x8x128xf32> to vector<1x8x128xf32>
    %51 = vector.shape_cast %50 : vector<1x8x128xf32> to vector<8x128xf32>
    %52 = vector.extract_strided_slice %10 {offsets = [7, 0, 0], sizes = [1, 8, 128], strides = [1, 1, 1]} : vector<8x8x128xf32> to vector<1x8x128xf32>
    %53 = vector.shape_cast %52 : vector<1x8x128xf32> to vector<8x128xf32>
    %54 = arith.select %40, %51, %53 : vector<8x128xi1>, vector<8x128xf32>
    %55 = arith.truncf %48 : vector<8x32xf32> to vector<8x32xbf16>
    %cst_20 = arith.constant dense<0.000000e+00> : vector<8x128xf32>
    %56 = tpu.matmul %55, %1, %cst_20 {dimension_numbers = #tpu.dot_dimension_numbers<[1], [0], [0], [1], [0, 0, 1, 1], [], []>} : vector<8x32xbf16>, vector<32x128xbf16>, vector<8x128xf32> -> vector<8x128xf32>
    %57 = arith.addf %54, %56 : vector<8x128xf32>
    %58 = arith.mulf %57, %19 : vector<8x128xf32>
    %59 = math.tanh %58 : vector<8x128xf32>
    %60 = arith.mulf %19, %59 : vector<8x128xf32>
    %61 = arith.addf %60, %22 : vector<8x128xf32>
    %62 = vector.extract_strided_slice %61 {offsets = [0, 0], sizes = [8, 32], strides = [1, 1]} : vector<8x128xf32> to vector<8x32xf32>
    %63 = vector.extract_strided_slice %61 {offsets = [0, 32], sizes = [8, 32], strides = [1, 1]} : vector<8x128xf32> to vector<8x32xf32>
    %64 = vector.extract_strided_slice %61 {offsets = [0, 64], sizes = [8, 32], strides = [1, 1]} : vector<8x128xf32> to vector<8x32xf32>
    %65 = vector.extract_strided_slice %61 {offsets = [0, 96], sizes = [8, 32], strides = [1, 1]} : vector<8x128xf32> to vector<8x32xf32>
    %66 = arith.mulf %63, %49 : vector<8x32xf32>
    %67 = arith.mulf %62, %64 : vector<8x32xf32>
    %68 = arith.addf %66, %67 : vector<8x32xf32>
    %69 = math.tanh %68 : vector<8x32xf32>
    %70 = arith.mulf %65, %69 : vector<8x32xf32>
    %c0_i32_21 = arith.constant 0 : i32
    %c7_i32 = arith.constant 7 : i32
    %71 = vector.broadcast %c0_i32_21 : i32 to vector<8x32xi32>
    %72 = vector.broadcast %c7_i32 : i32 to vector<8x32xi32>
    %73 = arith.select %43, %71, %72 : vector<8x32xi1>, vector<8x32xi32>
    %74 = arith.cmpi sgt, %45, %73 : vector<8x32xi32>
    %75 = arith.select %74, %70, %48 : vector<8x32xi1>, vector<8x32xf32>
    %76 = arith.select %74, %68, %49 : vector<8x32xi1>, vector<8x32xf32>
    %c0_i32_22 = arith.constant 0 : i32
    %77 = vector.broadcast %c0_i32_22 : i32 to vector<8x16xi32>
    %78 = arith.cmpi sgt, %47, %77 : vector<8x16xi32>
    %79 = vector.extract_strided_slice %75 {offsets = [0, 0], sizes = [8, 16], strides = [1, 1]} : vector<8x32xf32> to vector<8x16xf32>
    %cst_23 = arith.constant 0.000000e+00 : f32
    %80 = vector.broadcast %cst_23 : f32 to vector<8x16xf32>
    %81 = arith.select %78, %79, %80 : vector<8x16xi1>, vector<8x16xf32>
    %c0_24 = arith.constant 0 : index
    %c0_25 = arith.constant 0 : index
    %82 = vector.load %arg6[%c0_24, %c0_25] : memref<8x256xf32, #tpu.memory_space<vmem>>, vector<8x16xf32>
    tpu.vector_store %arg6[%c0_24, %c0_25], %81 {strides = array<i32>} : memref<8x256xf32, #tpu.memory_space<vmem>>, vector<8x16xf32>,
    %c7_i32_26 = arith.constant 7 : i32
    %83 = vector.broadcast %c7_i32_26 : i32 to vector<8x16xi32>
    %84 = arith.cmpi sgt, %47, %83 : vector<8x16xi32>
    %85 = vector.extract_strided_slice %75 {offsets = [0, 16], sizes = [8, 16], strides = [1, 1]} : vector<8x32xf32> to vector<8x16xf32>
    %cst_27 = arith.constant 0.000000e+00 : f32
    %86 = vector.broadcast %cst_27 : f32 to vector<8x16xf32>
    %87 = arith.select %84, %85, %86 : vector<8x16xi1>, vector<8x16xf32>
    %c0_28 = arith.constant 0 : index
    %c240 = arith.constant 240 : index
    %88 = vector.load %arg6[%c0_28, %c240] : memref<8x256xf32, #tpu.memory_space<vmem>>, vector<8x16xf32>
    tpu.vector_store %arg6[%c0_28, %c240], %87 {strides = array<i32>} : memref<8x256xf32, #tpu.memory_space<vmem>>, vector<8x16xf32>,
    %89 = vector.extract_strided_slice %10 {offsets = [1, 0, 0], sizes = [1, 8, 128], strides = [1, 1, 1]} : vector<8x8x128xf32> to vector<1x8x128xf32>
    %90 = vector.shape_cast %89 : vector<1x8x128xf32> to vector<8x128xf32>
    %91 = vector.extract_strided_slice %10 {offsets = [6, 0, 0], sizes = [1, 8, 128], strides = [1, 1, 1]} : vector<8x8x128xf32> to vector<1x8x128xf32>
    %92 = vector.shape_cast %91 : vector<1x8x128xf32> to vector<8x128xf32>
    %93 = arith.select %40, %90, %92 : vector<8x128xi1>, vector<8x128xf32>
    %94 = arith.truncf %75 : vector<8x32xf32> to vector<8x32xbf16>
    %cst_29 = arith.constant dense<0.000000e+00> : vector<8x128xf32>
    %95 = tpu.matmul %94, %1, %cst_29 {dimension_numbers = #tpu.dot_dimension_numbers<[1], [0], [0], [1], [0, 0, 1, 1], [], []>} : vector<8x32xbf16>, vector<32x128xbf16>, vector<8x128xf32> -> vector<8x128xf32>
    %96 = arith.addf %93, %95 : vector<8x128xf32>
    %97 = arith.mulf %96, %19 : vector<8x128xf32>
    %98 = math.tanh %97 : vector<8x128xf32>
    %99 = arith.mulf %19, %98 : vector<8x128xf32>
    %100 = arith.addf %99, %22 : vector<8x128xf32>
    %101 = vector.extract_strided_slice %100 {offsets = [0, 0], sizes = [8, 32], strides = [1, 1]} : vector<8x128xf32> to vector<8x32xf32>
    %102 = vector.extract_strided_slice %100 {offsets = [0, 32], sizes = [8, 32], strides = [1, 1]} : vector<8x128xf32> to vector<8x32xf32>
    %103 = vector.extract_strided_slice %100 {offsets = [0, 64], sizes = [8, 32], strides = [1, 1]} : vector<8x128xf32> to vector<8x32xf32>
    %104 = vector.extract_strided_slice %100 {offsets = [0, 96], sizes = [8, 32], strides = [1, 1]} : vector<8x128xf32> to vector<8x32xf32>
    %105 = arith.mulf %102, %76 : vector<8x32xf32>
    %106 = arith.mulf %101, %103 : vector<8x32xf32>
    %107 = arith.addf %105, %106 : vector<8x32xf32>
    %108 = math.tanh %107 : vector<8x32xf32>
    %109 = arith.mulf %104, %108 : vector<8x32xf32>
    %c1_i32_30 = arith.constant 1 : i32
    %c6_i32 = arith.constant 6 : i32
    %110 = vector.broadcast %c1_i32_30 : i32 to vector<8x32xi32>
    %111 = vector.broadcast %c6_i32 : i32 to vector<8x32xi32>
    %112 = arith.select %43, %110, %111 : vector<8x32xi1>, vector<8x32xi32>
    %113 = arith.cmpi sgt, %45, %112 : vector<8x32xi32>
    %114 = arith.select %113, %109, %75 : vector<8x32xi1>, vector<8x32xf32>
    %115 = arith.select %113, %107, %76 : vector<8x32xi1>, vector<8x32xf32>
    %c1_i32_31 = arith.constant 1 : i32
    %116 = vector.broadcast %c1_i32_31 : i32 to vector<8x16xi32>
    %117 = arith.cmpi sgt, %47, %116 : vector<8x16xi32>
    %118 = vector.extract_strided_slice %114 {offsets = [0, 0], sizes = [8, 16], strides = [1, 1]} : vector<8x32xf32> to vector<8x16xf32>
    %cst_32 = arith.constant 0.000000e+00 : f32
    %119 = vector.broadcast %cst_32 : f32 to vector<8x16xf32>
    %120 = arith.select %117, %118, %119 : vector<8x16xi1>, vector<8x16xf32>
    %c0_33 = arith.constant 0 : index
    %c32 = arith.constant 32 : index
    %121 = vector.load %arg6[%c0_33, %c32] : memref<8x256xf32, #tpu.memory_space<vmem>>, vector<8x16xf32>
    tpu.vector_store %arg6[%c0_33, %c32], %120 {strides = array<i32>} : memref<8x256xf32, #tpu.memory_space<vmem>>, vector<8x16xf32>,
    %c6_i32_34 = arith.constant 6 : i32
    %122 = vector.broadcast %c6_i32_34 : i32 to vector<8x16xi32>
    %123 = arith.cmpi sgt, %47, %122 : vector<8x16xi32>
    %124 = vector.extract_strided_slice %114 {offsets = [0, 16], sizes = [8, 16], strides = [1, 1]} : vector<8x32xf32> to vector<8x16xf32>
    %cst_35 = arith.constant 0.000000e+00 : f32
    %125 = vector.broadcast %cst_35 : f32 to vector<8x16xf32>
    %126 = arith.select %123, %124, %125 : vector<8x16xi1>, vector<8x16xf32>
    %c0_36 = arith.constant 0 : index
    %c208 = arith.constant 208 : index
    %127 = vector.load %arg6[%c0_36, %c208] : memref<8x256xf32, #tpu.memory_space<vmem>>, vector<8x16xf32>
    tpu.vector_store %arg6[%c0_36, %c208], %126 {strides = array<i32>} : memref<8x256xf32, #tpu.memory_space<vmem>>, vector<8x16xf32>,
    %128 = vector.extract_strided_slice %10 {offsets = [2, 0, 0], sizes = [1, 8, 128], strides = [1, 1, 1]} : vector<8x8x128xf32> to vector<1x8x128xf32>
    %129 = vector.shape_cast %128 : vector<1x8x128xf32> to vector<8x128xf32>
    %130 = vector.extract_strided_slice %10 {offsets = [5, 0, 0], sizes = [1, 8, 128], strides = [1, 1, 1]} : vector<8x8x128xf32> to vector<1x8x128xf32>
    %131 = vector.shape_cast %130 : vector<1x8x128xf32> to vector<8x128xf32>
    %132 = arith.select %40, %129, %131 : vector<8x128xi1>, vector<8x128xf32>
    %133 = arith.truncf %114 : vector<8x32xf32> to vector<8x32xbf16>
    %cst_37 = arith.constant dense<0.000000e+00> : vector<8x128xf32>
    %134 = tpu.matmul %133, %1, %cst_37 {dimension_numbers = #tpu.dot_dimension_numbers<[1], [0], [0], [1], [0, 0, 1, 1], [], []>} : vector<8x32xbf16>, vector<32x128xbf16>, vector<8x128xf32> -> vector<8x128xf32>
    %135 = arith.addf %132, %134 : vector<8x128xf32>
    %136 = arith.mulf %135, %19 : vector<8x128xf32>
    %137 = math.tanh %136 : vector<8x128xf32>
    %138 = arith.mulf %19, %137 : vector<8x128xf32>
    %139 = arith.addf %138, %22 : vector<8x128xf32>
    %140 = vector.extract_strided_slice %139 {offsets = [0, 0], sizes = [8, 32], strides = [1, 1]} : vector<8x128xf32> to vector<8x32xf32>
    %141 = vector.extract_strided_slice %139 {offsets = [0, 32], sizes = [8, 32], strides = [1, 1]} : vector<8x128xf32> to vector<8x32xf32>
    %142 = vector.extract_strided_slice %139 {offsets = [0, 64], sizes = [8, 32], strides = [1, 1]} : vector<8x128xf32> to vector<8x32xf32>
    %143 = vector.extract_strided_slice %139 {offsets = [0, 96], sizes = [8, 32], strides = [1, 1]} : vector<8x128xf32> to vector<8x32xf32>
    %144 = arith.mulf %141, %115 : vector<8x32xf32>
    %145 = arith.mulf %140, %142 : vector<8x32xf32>
    %146 = arith.addf %144, %145 : vector<8x32xf32>
    %147 = math.tanh %146 : vector<8x32xf32>
    %148 = arith.mulf %143, %147 : vector<8x32xf32>
    %c2_i32 = arith.constant 2 : i32
    %c5_i32 = arith.constant 5 : i32
    %149 = vector.broadcast %c2_i32 : i32 to vector<8x32xi32>
    %150 = vector.broadcast %c5_i32 : i32 to vector<8x32xi32>
    %151 = arith.select %43, %149, %150 : vector<8x32xi1>, vector<8x32xi32>
    %152 = arith.cmpi sgt, %45, %151 : vector<8x32xi32>
    %153 = arith.select %152, %148, %114 : vector<8x32xi1>, vector<8x32xf32>
    %154 = arith.select %152, %146, %115 : vector<8x32xi1>, vector<8x32xf32>
    %c2_i32_38 = arith.constant 2 : i32
    %155 = vector.broadcast %c2_i32_38 : i32 to vector<8x16xi32>
    %156 = arith.cmpi sgt, %47, %155 : vector<8x16xi32>
    %157 = vector.extract_strided_slice %153 {offsets = [0, 0], sizes = [8, 16], strides = [1, 1]} : vector<8x32xf32> to vector<8x16xf32>
    %cst_39 = arith.constant 0.000000e+00 : f32
    %158 = vector.broadcast %cst_39 : f32 to vector<8x16xf32>
    %159 = arith.select %156, %157, %158 : vector<8x16xi1>, vector<8x16xf32>
    %c0_40 = arith.constant 0 : index
    %c64 = arith.constant 64 : index
    %160 = vector.load %arg6[%c0_40, %c64] : memref<8x256xf32, #tpu.memory_space<vmem>>, vector<8x16xf32>
    tpu.vector_store %arg6[%c0_40, %c64], %159 {strides = array<i32>} : memref<8x256xf32, #tpu.memory_space<vmem>>, vector<8x16xf32>,
    %c5_i32_41 = arith.constant 5 : i32
    %161 = vector.broadcast %c5_i32_41 : i32 to vector<8x16xi32>
    %162 = arith.cmpi sgt, %47, %161 : vector<8x16xi32>
    %163 = vector.extract_strided_slice %153 {offsets = [0, 16], sizes = [8, 16], strides = [1, 1]} : vector<8x32xf32> to vector<8x16xf32>
    %cst_42 = arith.constant 0.000000e+00 : f32
    %164 = vector.broadcast %cst_42 : f32 to vector<8x16xf32>
    %165 = arith.select %162, %163, %164 : vector<8x16xi1>, vector<8x16xf32>
    %c0_43 = arith.constant 0 : index
    %c176 = arith.constant 176 : index
    %166 = vector.load %arg6[%c0_43, %c176] : memref<8x256xf32, #tpu.memory_space<vmem>>, vector<8x16xf32>
    tpu.vector_store %arg6[%c0_43, %c176], %165 {strides = array<i32>} : memref<8x256xf32, #tpu.memory_space<vmem>>, vector<8x16xf32>,
    %167 = vector.extract_strided_slice %10 {offsets = [3, 0, 0], sizes = [1, 8, 128], strides = [1, 1, 1]} : vector<8x8x128xf32> to vector<1x8x128xf32>
    %168 = vector.shape_cast %167 : vector<1x8x128xf32> to vector<8x128xf32>
    %169 = vector.extract_strided_slice %10 {offsets = [4, 0, 0], sizes = [1, 8, 128], strides = [1, 1, 1]} : vector<8x8x128xf32> to vector<1x8x128xf32>
    %170 = vector.shape_cast %169 : vector<1x8x128xf32> to vector<8x128xf32>
    %171 = arith.select %40, %168, %170 : vector<8x128xi1>, vector<8x128xf32>
    %172 = arith.truncf %153 : vector<8x32xf32> to vector<8x32xbf16>
    %cst_44 = arith.constant dense<0.000000e+00> : vector<8x128xf32>
    %173 = tpu.matmul %172, %1, %cst_44 {dimension_numbers = #tpu.dot_dimension_numbers<[1], [0], [0], [1], [0, 0, 1, 1], [], []>} : vector<8x32xbf16>, vector<32x128xbf16>, vector<8x128xf32> -> vector<8x128xf32>
    %174 = arith.addf %171, %173 : vector<8x128xf32>
    %175 = arith.mulf %174, %19 : vector<8x128xf32>
    %176 = math.tanh %175 : vector<8x128xf32>
    %177 = arith.mulf %19, %176 : vector<8x128xf32>
    %178 = arith.addf %177, %22 : vector<8x128xf32>
    %179 = vector.extract_strided_slice %178 {offsets = [0, 0], sizes = [8, 32], strides = [1, 1]} : vector<8x128xf32> to vector<8x32xf32>
    %180 = vector.extract_strided_slice %178 {offsets = [0, 32], sizes = [8, 32], strides = [1, 1]} : vector<8x128xf32> to vector<8x32xf32>
    %181 = vector.extract_strided_slice %178 {offsets = [0, 64], sizes = [8, 32], strides = [1, 1]} : vector<8x128xf32> to vector<8x32xf32>
    %182 = vector.extract_strided_slice %178 {offsets = [0, 96], sizes = [8, 32], strides = [1, 1]} : vector<8x128xf32> to vector<8x32xf32>
    %183 = arith.mulf %180, %154 : vector<8x32xf32>
    %184 = arith.mulf %179, %181 : vector<8x32xf32>
    %185 = arith.addf %183, %184 : vector<8x32xf32>
    %186 = math.tanh %185 : vector<8x32xf32>
    %187 = arith.mulf %182, %186 : vector<8x32xf32>
    %c3_i32 = arith.constant 3 : i32
    %c4_i32 = arith.constant 4 : i32
    %188 = vector.broadcast %c3_i32 : i32 to vector<8x32xi32>
    %189 = vector.broadcast %c4_i32 : i32 to vector<8x32xi32>
    %190 = arith.select %43, %188, %189 : vector<8x32xi1>, vector<8x32xi32>
    %191 = arith.cmpi sgt, %45, %190 : vector<8x32xi32>
    %192 = arith.select %191, %187, %153 : vector<8x32xi1>, vector<8x32xf32>
    %193 = arith.select %191, %185, %154 : vector<8x32xi1>, vector<8x32xf32>
    %c3_i32_45 = arith.constant 3 : i32
    %194 = vector.broadcast %c3_i32_45 : i32 to vector<8x16xi32>
    %195 = arith.cmpi sgt, %47, %194 : vector<8x16xi32>
    %196 = vector.extract_strided_slice %192 {offsets = [0, 0], sizes = [8, 16], strides = [1, 1]} : vector<8x32xf32> to vector<8x16xf32>
    %cst_46 = arith.constant 0.000000e+00 : f32
    %197 = vector.broadcast %cst_46 : f32 to vector<8x16xf32>
    %198 = arith.select %195, %196, %197 : vector<8x16xi1>, vector<8x16xf32>
    %c0_47 = arith.constant 0 : index
    %c96 = arith.constant 96 : index
    %199 = vector.load %arg6[%c0_47, %c96] : memref<8x256xf32, #tpu.memory_space<vmem>>, vector<8x16xf32>
    tpu.vector_store %arg6[%c0_47, %c96], %198 {strides = array<i32>} : memref<8x256xf32, #tpu.memory_space<vmem>>, vector<8x16xf32>,
    %c4_i32_48 = arith.constant 4 : i32
    %200 = vector.broadcast %c4_i32_48 : i32 to vector<8x16xi32>
    %201 = arith.cmpi sgt, %47, %200 : vector<8x16xi32>
    %202 = vector.extract_strided_slice %192 {offsets = [0, 16], sizes = [8, 16], strides = [1, 1]} : vector<8x32xf32> to vector<8x16xf32>
    %cst_49 = arith.constant 0.000000e+00 : f32
    %203 = vector.broadcast %cst_49 : f32 to vector<8x16xf32>
    %204 = arith.select %201, %202, %203 : vector<8x16xi1>, vector<8x16xf32>
    %c0_50 = arith.constant 0 : index
    %c144 = arith.constant 144 : index
    %205 = vector.load %arg6[%c0_50, %c144] : memref<8x256xf32, #tpu.memory_space<vmem>>, vector<8x16xf32>
    tpu.vector_store %arg6[%c0_50, %c144], %204 {strides = array<i32>} : memref<8x256xf32, #tpu.memory_space<vmem>>, vector<8x16xf32>,
    %206 = vector.extract_strided_slice %10 {offsets = [4, 0, 0], sizes = [1, 8, 128], strides = [1, 1, 1]} : vector<8x8x128xf32> to vector<1x8x128xf32>
    %207 = vector.shape_cast %206 : vector<1x8x128xf32> to vector<8x128xf32>
    %208 = vector.extract_strided_slice %10 {offsets = [3, 0, 0], sizes = [1, 8, 128], strides = [1, 1, 1]} : vector<8x8x128xf32> to vector<1x8x128xf32>
    %209 = vector.shape_cast %208 : vector<1x8x128xf32> to vector<8x128xf32>
    %210 = arith.select %40, %207, %209 : vector<8x128xi1>, vector<8x128xf32>
    %211 = arith.truncf %192 : vector<8x32xf32> to vector<8x32xbf16>
    %cst_51 = arith.constant dense<0.000000e+00> : vector<8x128xf32>
    %212 = tpu.matmul %211, %1, %cst_51 {dimension_numbers = #tpu.dot_dimension_numbers<[1], [0], [0], [1], [0, 0, 1, 1], [], []>} : vector<8x32xbf16>, vector<32x128xbf16>, vector<8x128xf32> -> vector<8x128xf32>
    %213 = arith.addf %210, %212 : vector<8x128xf32>
    %214 = arith.mulf %213, %19 : vector<8x128xf32>
    %215 = math.tanh %214 : vector<8x128xf32>
    %216 = arith.mulf %19, %215 : vector<8x128xf32>
    %217 = arith.addf %216, %22 : vector<8x128xf32>
    %218 = vector.extract_strided_slice %217 {offsets = [0, 0], sizes = [8, 32], strides = [1, 1]} : vector<8x128xf32> to vector<8x32xf32>
    %219 = vector.extract_strided_slice %217 {offsets = [0, 32], sizes = [8, 32], strides = [1, 1]} : vector<8x128xf32> to vector<8x32xf32>
    %220 = vector.extract_strided_slice %217 {offsets = [0, 64], sizes = [8, 32], strides = [1, 1]} : vector<8x128xf32> to vector<8x32xf32>
    %221 = vector.extract_strided_slice %217 {offsets = [0, 96], sizes = [8, 32], strides = [1, 1]} : vector<8x128xf32> to vector<8x32xf32>
    %222 = arith.mulf %219, %193 : vector<8x32xf32>
    %223 = arith.mulf %218, %220 : vector<8x32xf32>
    %224 = arith.addf %222, %223 : vector<8x32xf32>
    %225 = math.tanh %224 : vector<8x32xf32>
    %226 = arith.mulf %221, %225 : vector<8x32xf32>
    %c4_i32_52 = arith.constant 4 : i32
    %c3_i32_53 = arith.constant 3 : i32
    %227 = vector.broadcast %c4_i32_52 : i32 to vector<8x32xi32>
    %228 = vector.broadcast %c3_i32_53 : i32 to vector<8x32xi32>
    %229 = arith.select %43, %227, %228 : vector<8x32xi1>, vector<8x32xi32>
    %230 = arith.cmpi sgt, %45, %229 : vector<8x32xi32>
    %231 = arith.select %230, %226, %192 : vector<8x32xi1>, vector<8x32xf32>
    %232 = arith.select %230, %224, %193 : vector<8x32xi1>, vector<8x32xf32>
    %c4_i32_54 = arith.constant 4 : i32
    %233 = vector.broadcast %c4_i32_54 : i32 to vector<8x16xi32>
    %234 = arith.cmpi sgt, %47, %233 : vector<8x16xi32>
    %235 = vector.extract_strided_slice %231 {offsets = [0, 0], sizes = [8, 16], strides = [1, 1]} : vector<8x32xf32> to vector<8x16xf32>
    %cst_55 = arith.constant 0.000000e+00 : f32
    %236 = vector.broadcast %cst_55 : f32 to vector<8x16xf32>
    %237 = arith.select %234, %235, %236 : vector<8x16xi1>, vector<8x16xf32>
    %c0_56 = arith.constant 0 : index
    %c128 = arith.constant 128 : index
    %238 = vector.load %arg6[%c0_56, %c128] : memref<8x256xf32, #tpu.memory_space<vmem>>, vector<8x16xf32>
    tpu.vector_store %arg6[%c0_56, %c128], %237 {strides = array<i32>} : memref<8x256xf32, #tpu.memory_space<vmem>>, vector<8x16xf32>,
    %c3_i32_57 = arith.constant 3 : i32
    %239 = vector.broadcast %c3_i32_57 : i32 to vector<8x16xi32>
    %240 = arith.cmpi sgt, %47, %239 : vector<8x16xi32>
    %241 = vector.extract_strided_slice %231 {offsets = [0, 16], sizes = [8, 16], strides = [1, 1]} : vector<8x32xf32> to vector<8x16xf32>
    %cst_58 = arith.constant 0.000000e+00 : f32
    %242 = vector.broadcast %cst_58 : f32 to vector<8x16xf32>
    %243 = arith.select %240, %241, %242 : vector<8x16xi1>, vector<8x16xf32>
    %c0_59 = arith.constant 0 : index
    %c112 = arith.constant 112 : index
    %244 = vector.load %arg6[%c0_59, %c112] : memref<8x256xf32, #tpu.memory_space<vmem>>, vector<8x16xf32>
    tpu.vector_store %arg6[%c0_59, %c112], %243 {strides = array<i32>} : memref<8x256xf32, #tpu.memory_space<vmem>>, vector<8x16xf32>,
    %245 = vector.extract_strided_slice %10 {offsets = [5, 0, 0], sizes = [1, 8, 128], strides = [1, 1, 1]} : vector<8x8x128xf32> to vector<1x8x128xf32>
    %246 = vector.shape_cast %245 : vector<1x8x128xf32> to vector<8x128xf32>
    %247 = vector.extract_strided_slice %10 {offsets = [2, 0, 0], sizes = [1, 8, 128], strides = [1, 1, 1]} : vector<8x8x128xf32> to vector<1x8x128xf32>
    %248 = vector.shape_cast %247 : vector<1x8x128xf32> to vector<8x128xf32>
    %249 = arith.select %40, %246, %248 : vector<8x128xi1>, vector<8x128xf32>
    %250 = arith.truncf %231 : vector<8x32xf32> to vector<8x32xbf16>
    %cst_60 = arith.constant dense<0.000000e+00> : vector<8x128xf32>
    %251 = tpu.matmul %250, %1, %cst_60 {dimension_numbers = #tpu.dot_dimension_numbers<[1], [0], [0], [1], [0, 0, 1, 1], [], []>} : vector<8x32xbf16>, vector<32x128xbf16>, vector<8x128xf32> -> vector<8x128xf32>
    %252 = arith.addf %249, %251 : vector<8x128xf32>
    %253 = arith.mulf %252, %19 : vector<8x128xf32>
    %254 = math.tanh %253 : vector<8x128xf32>
    %255 = arith.mulf %19, %254 : vector<8x128xf32>
    %256 = arith.addf %255, %22 : vector<8x128xf32>
    %257 = vector.extract_strided_slice %256 {offsets = [0, 0], sizes = [8, 32], strides = [1, 1]} : vector<8x128xf32> to vector<8x32xf32>
    %258 = vector.extract_strided_slice %256 {offsets = [0, 32], sizes = [8, 32], strides = [1, 1]} : vector<8x128xf32> to vector<8x32xf32>
    %259 = vector.extract_strided_slice %256 {offsets = [0, 64], sizes = [8, 32], strides = [1, 1]} : vector<8x128xf32> to vector<8x32xf32>
    %260 = vector.extract_strided_slice %256 {offsets = [0, 96], sizes = [8, 32], strides = [1, 1]} : vector<8x128xf32> to vector<8x32xf32>
    %261 = arith.mulf %258, %232 : vector<8x32xf32>
    %262 = arith.mulf %257, %259 : vector<8x32xf32>
    %263 = arith.addf %261, %262 : vector<8x32xf32>
    %264 = math.tanh %263 : vector<8x32xf32>
    %265 = arith.mulf %260, %264 : vector<8x32xf32>
    %c5_i32_61 = arith.constant 5 : i32
    %c2_i32_62 = arith.constant 2 : i32
    %266 = vector.broadcast %c5_i32_61 : i32 to vector<8x32xi32>
    %267 = vector.broadcast %c2_i32_62 : i32 to vector<8x32xi32>
    %268 = arith.select %43, %266, %267 : vector<8x32xi1>, vector<8x32xi32>
    %269 = arith.cmpi sgt, %45, %268 : vector<8x32xi32>
    %270 = arith.select %269, %265, %231 : vector<8x32xi1>, vector<8x32xf32>
    %271 = arith.select %269, %263, %232 : vector<8x32xi1>, vector<8x32xf32>
    %c5_i32_63 = arith.constant 5 : i32
    %272 = vector.broadcast %c5_i32_63 : i32 to vector<8x16xi32>
    %273 = arith.cmpi sgt, %47, %272 : vector<8x16xi32>
    %274 = vector.extract_strided_slice %270 {offsets = [0, 0], sizes = [8, 16], strides = [1, 1]} : vector<8x32xf32> to vector<8x16xf32>
    %cst_64 = arith.constant 0.000000e+00 : f32
    %275 = vector.broadcast %cst_64 : f32 to vector<8x16xf32>
    %276 = arith.select %273, %274, %275 : vector<8x16xi1>, vector<8x16xf32>
    %c0_65 = arith.constant 0 : index
    %c160 = arith.constant 160 : index
    %277 = vector.load %arg6[%c0_65, %c160] : memref<8x256xf32, #tpu.memory_space<vmem>>, vector<8x16xf32>
    tpu.vector_store %arg6[%c0_65, %c160], %276 {strides = array<i32>} : memref<8x256xf32, #tpu.memory_space<vmem>>, vector<8x16xf32>,
    %c2_i32_66 = arith.constant 2 : i32
    %278 = vector.broadcast %c2_i32_66 : i32 to vector<8x16xi32>
    %279 = arith.cmpi sgt, %47, %278 : vector<8x16xi32>
    %280 = vector.extract_strided_slice %270 {offsets = [0, 16], sizes = [8, 16], strides = [1, 1]} : vector<8x32xf32> to vector<8x16xf32>
    %cst_67 = arith.constant 0.000000e+00 : f32
    %281 = vector.broadcast %cst_67 : f32 to vector<8x16xf32>
    %282 = arith.select %279, %280, %281 : vector<8x16xi1>, vector<8x16xf32>
    %c0_68 = arith.constant 0 : index
    %c80 = arith.constant 80 : index
    %283 = vector.load %arg6[%c0_68, %c80] : memref<8x256xf32, #tpu.memory_space<vmem>>, vector<8x16xf32>
    tpu.vector_store %arg6[%c0_68, %c80], %282 {strides = array<i32>} : memref<8x256xf32, #tpu.memory_space<vmem>>, vector<8x16xf32>,
    %284 = vector.extract_strided_slice %10 {offsets = [6, 0, 0], sizes = [1, 8, 128], strides = [1, 1, 1]} : vector<8x8x128xf32> to vector<1x8x128xf32>
    %285 = vector.shape_cast %284 : vector<1x8x128xf32> to vector<8x128xf32>
    %286 = vector.extract_strided_slice %10 {offsets = [1, 0, 0], sizes = [1, 8, 128], strides = [1, 1, 1]} : vector<8x8x128xf32> to vector<1x8x128xf32>
    %287 = vector.shape_cast %286 : vector<1x8x128xf32> to vector<8x128xf32>
    %288 = arith.select %40, %285, %287 : vector<8x128xi1>, vector<8x128xf32>
    %289 = arith.truncf %270 : vector<8x32xf32> to vector<8x32xbf16>
    %cst_69 = arith.constant dense<0.000000e+00> : vector<8x128xf32>
    %290 = tpu.matmul %289, %1, %cst_69 {dimension_numbers = #tpu.dot_dimension_numbers<[1], [0], [0], [1], [0, 0, 1, 1], [], []>} : vector<8x32xbf16>, vector<32x128xbf16>, vector<8x128xf32> -> vector<8x128xf32>
    %291 = arith.addf %288, %290 : vector<8x128xf32>
    %292 = arith.mulf %291, %19 : vector<8x128xf32>
    %293 = math.tanh %292 : vector<8x128xf32>
    %294 = arith.mulf %19, %293 : vector<8x128xf32>
    %295 = arith.addf %294, %22 : vector<8x128xf32>
    %296 = vector.extract_strided_slice %295 {offsets = [0, 0], sizes = [8, 32], strides = [1, 1]} : vector<8x128xf32> to vector<8x32xf32>
    %297 = vector.extract_strided_slice %295 {offsets = [0, 32], sizes = [8, 32], strides = [1, 1]} : vector<8x128xf32> to vector<8x32xf32>
    %298 = vector.extract_strided_slice %295 {offsets = [0, 64], sizes = [8, 32], strides = [1, 1]} : vector<8x128xf32> to vector<8x32xf32>
    %299 = vector.extract_strided_slice %295 {offsets = [0, 96], sizes = [8, 32], strides = [1, 1]} : vector<8x128xf32> to vector<8x32xf32>
    %300 = arith.mulf %297, %271 : vector<8x32xf32>
    %301 = arith.mulf %296, %298 : vector<8x32xf32>
    %302 = arith.addf %300, %301 : vector<8x32xf32>
    %303 = math.tanh %302 : vector<8x32xf32>
    %304 = arith.mulf %299, %303 : vector<8x32xf32>
    %c6_i32_70 = arith.constant 6 : i32
    %c1_i32_71 = arith.constant 1 : i32
    %305 = vector.broadcast %c6_i32_70 : i32 to vector<8x32xi32>
    %306 = vector.broadcast %c1_i32_71 : i32 to vector<8x32xi32>
    %307 = arith.select %43, %305, %306 : vector<8x32xi1>, vector<8x32xi32>
    %308 = arith.cmpi sgt, %45, %307 : vector<8x32xi32>
    %309 = arith.select %308, %304, %270 : vector<8x32xi1>, vector<8x32xf32>
    %310 = arith.select %308, %302, %271 : vector<8x32xi1>, vector<8x32xf32>
    %c6_i32_72 = arith.constant 6 : i32
    %311 = vector.broadcast %c6_i32_72 : i32 to vector<8x16xi32>
    %312 = arith.cmpi sgt, %47, %311 : vector<8x16xi32>
    %313 = vector.extract_strided_slice %309 {offsets = [0, 0], sizes = [8, 16], strides = [1, 1]} : vector<8x32xf32> to vector<8x16xf32>
    %cst_73 = arith.constant 0.000000e+00 : f32
    %314 = vector.broadcast %cst_73 : f32 to vector<8x16xf32>
    %315 = arith.select %312, %313, %314 : vector<8x16xi1>, vector<8x16xf32>
    %c0_74 = arith.constant 0 : index
    %c192 = arith.constant 192 : index
    %316 = vector.load %arg6[%c0_74, %c192] : memref<8x256xf32, #tpu.memory_space<vmem>>, vector<8x16xf32>
    tpu.vector_store %arg6[%c0_74, %c192], %315 {strides = array<i32>} : memref<8x256xf32, #tpu.memory_space<vmem>>, vector<8x16xf32>,
    %c1_i32_75 = arith.constant 1 : i32
    %317 = vector.broadcast %c1_i32_75 : i32 to vector<8x16xi32>
    %318 = arith.cmpi sgt, %47, %317 : vector<8x16xi32>
    %319 = vector.extract_strided_slice %309 {offsets = [0, 16], sizes = [8, 16], strides = [1, 1]} : vector<8x32xf32> to vector<8x16xf32>
    %cst_76 = arith.constant 0.000000e+00 : f32
    %320 = vector.broadcast %cst_76 : f32 to vector<8x16xf32>
    %321 = arith.select %318, %319, %320 : vector<8x16xi1>, vector<8x16xf32>
    %c0_77 = arith.constant 0 : index
    %c48 = arith.constant 48 : index
    %322 = vector.load %arg6[%c0_77, %c48] : memref<8x256xf32, #tpu.memory_space<vmem>>, vector<8x16xf32>
    tpu.vector_store %arg6[%c0_77, %c48], %321 {strides = array<i32>} : memref<8x256xf32, #tpu.memory_space<vmem>>, vector<8x16xf32>,
    %323 = vector.extract_strided_slice %10 {offsets = [7, 0, 0], sizes = [1, 8, 128], strides = [1, 1, 1]} : vector<8x8x128xf32> to vector<1x8x128xf32>
    %324 = vector.shape_cast %323 : vector<1x8x128xf32> to vector<8x128xf32>
    %325 = vector.extract_strided_slice %10 {offsets = [0, 0, 0], sizes = [1, 8, 128], strides = [1, 1, 1]} : vector<8x8x128xf32> to vector<1x8x128xf32>
    %326 = vector.shape_cast %325 : vector<1x8x128xf32> to vector<8x128xf32>
    %327 = arith.select %40, %324, %326 : vector<8x128xi1>, vector<8x128xf32>
    %328 = arith.truncf %309 : vector<8x32xf32> to vector<8x32xbf16>
    %cst_78 = arith.constant dense<0.000000e+00> : vector<8x128xf32>
    %329 = tpu.matmul %328, %1, %cst_78 {dimension_numbers = #tpu.dot_dimension_numbers<[1], [0], [0], [1], [0, 0, 1, 1], [], []>} : vector<8x32xbf16>, vector<32x128xbf16>, vector<8x128xf32> -> vector<8x128xf32>
    %330 = arith.addf %327, %329 : vector<8x128xf32>
    %331 = arith.mulf %330, %19 : vector<8x128xf32>
    %332 = math.tanh %331 : vector<8x128xf32>
    %333 = arith.mulf %19, %332 : vector<8x128xf32>
    %334 = arith.addf %333, %22 : vector<8x128xf32>
    %335 = vector.extract_strided_slice %334 {offsets = [0, 0], sizes = [8, 32], strides = [1, 1]} : vector<8x128xf32> to vector<8x32xf32>
    %336 = vector.extract_strided_slice %334 {offsets = [0, 32], sizes = [8, 32], strides = [1, 1]} : vector<8x128xf32> to vector<8x32xf32>
    %337 = vector.extract_strided_slice %334 {offsets = [0, 64], sizes = [8, 32], strides = [1, 1]} : vector<8x128xf32> to vector<8x32xf32>
    %338 = vector.extract_strided_slice %334 {offsets = [0, 96], sizes = [8, 32], strides = [1, 1]} : vector<8x128xf32> to vector<8x32xf32>
    %339 = arith.mulf %336, %310 : vector<8x32xf32>
    %340 = arith.mulf %335, %337 : vector<8x32xf32>
    %341 = arith.addf %339, %340 : vector<8x32xf32>
    %342 = math.tanh %341 : vector<8x32xf32>
    %343 = arith.mulf %338, %342 : vector<8x32xf32>
    %c7_i32_79 = arith.constant 7 : i32
    %c0_i32_80 = arith.constant 0 : i32
    %344 = vector.broadcast %c7_i32_79 : i32 to vector<8x32xi32>
    %345 = vector.broadcast %c0_i32_80 : i32 to vector<8x32xi32>
    %346 = arith.select %43, %344, %345 : vector<8x32xi1>, vector<8x32xi32>
    %347 = arith.cmpi sgt, %45, %346 : vector<8x32xi32>
    %348 = arith.select %347, %343, %309 : vector<8x32xi1>, vector<8x32xf32>
    %c7_i32_81 = arith.constant 7 : i32
    %349 = vector.broadcast %c7_i32_81 : i32 to vector<8x16xi32>
    %350 = arith.cmpi sgt, %47, %349 : vector<8x16xi32>
    %351 = vector.extract_strided_slice %348 {offsets = [0, 0], sizes = [8, 16], strides = [1, 1]} : vector<8x32xf32> to vector<8x16xf32>
    %cst_82 = arith.constant 0.000000e+00 : f32
    %352 = vector.broadcast %cst_82 : f32 to vector<8x16xf32>
    %353 = arith.select %350, %351, %352 : vector<8x16xi1>, vector<8x16xf32>
    %c0_83 = arith.constant 0 : index
    %c224 = arith.constant 224 : index
    %354 = vector.load %arg6[%c0_83, %c224] : memref<8x256xf32, #tpu.memory_space<vmem>>, vector<8x16xf32>
    tpu.vector_store %arg6[%c0_83, %c224], %353 {strides = array<i32>} : memref<8x256xf32, #tpu.memory_space<vmem>>, vector<8x16xf32>,
    %c0_i32_84 = arith.constant 0 : i32
    %355 = vector.broadcast %c0_i32_84 : i32 to vector<8x16xi32>
    %356 = arith.cmpi sgt, %47, %355 : vector<8x16xi32>
    %357 = vector.extract_strided_slice %348 {offsets = [0, 16], sizes = [8, 16], strides = [1, 1]} : vector<8x32xf32> to vector<8x16xf32>
    %cst_85 = arith.constant 0.000000e+00 : f32
    %358 = vector.broadcast %cst_85 : f32 to vector<8x16xf32>
    %359 = arith.select %356, %357, %358 : vector<8x16xi1>, vector<8x16xf32>
    %c0_86 = arith.constant 0 : index
    %c16 = arith.constant 16 : index
    %360 = vector.load %arg6[%c0_86, %c16] : memref<8x256xf32, #tpu.memory_space<vmem>>, vector<8x16xf32>
    tpu.vector_store %arg6[%c0_86, %c16], %359 {strides = array<i32>} : memref<8x256xf32, #tpu.memory_space<vmem>>, vector<8x16xf32>,
    %c0_87 = arith.constant 0 : index
    %c0_88 = arith.constant 0 : index
    %361 = vector.load %arg7[%c0_87, %c0_88] : memref<8x32xf32, #tpu.memory_space<vmem>>, vector<8x32xf32>
    tpu.vector_store %arg7[%c0_87, %c0_88], %348 {strides = array<i32>} : memref<8x32xf32, #tpu.memory_space<vmem>>, vector<8x32xf32>,
    return
  }
  func.func @transform_0(%arg0: i32) -> (i32, i32, i32) {
    %c0_i32 = arith.constant 0 : i32
    %c0_i32_0 = arith.constant 0 : i32
    %c0_i32_1 = arith.constant 0 : i32
    return %c0_i32, %arg0, %c0_i32_0 : i32, i32, i32
  }
  func.func @transform_1(%arg0: i32) -> (i32, i32) {
    %c0_i32 = arith.constant 0 : i32
    %c0_i32_0 = arith.constant 0 : i32
    return %arg0, %c0_i32 : i32, i32
  }
  func.func @transform_2(%arg0: i32) -> (i32, i32) {
    %c0_i32 = arith.constant 0 : i32
    %c0_i32_0 = arith.constant 0 : i32
    %c0_i32_1 = arith.constant 0 : i32
    return %c0_i32, %c0_i32_0 : i32, i32
  }
  func.func @transform_3(%arg0: i32) -> (i32, i32) {
    %c0_i32 = arith.constant 0 : i32
    %c0_i32_0 = arith.constant 0 : i32
    %c0_i32_1 = arith.constant 0 : i32
    return %c0_i32, %c0_i32_0 : i32, i32
  }
  func.func @transform_4(%arg0: i32) -> (i32, i32) {
    %c0_i32 = arith.constant 0 : i32
    %c0_i32_0 = arith.constant 0 : i32
    %c0_i32_1 = arith.constant 0 : i32
    return %c0_i32, %c0_i32_0 : i32, i32
  }
  func.func @transform_5(%arg0: i32) -> (i32, i32) {
    %c0_i32 = arith.constant 0 : i32
    %c0_i32_0 = arith.constant 0 : i32
    return %arg0, %c0_i32 : i32, i32
  }
  func.func @transform_6(%arg0: i32) -> (i32, i32) {
    %c0_i32 = arith.constant 0 : i32
    %c0_i32_0 = arith.constant 0 : i32
    return %arg0, %c0_i32 : i32, i32
  }
}

</mosaic_0001>

<bundles_post_ra>
// kernel: rnn_encoder_forward.1
= control target key start
LH: loop header
LB: loop body
LE: loop exit
PB: predicated region body
PF: predicated region fallthrough
CT: control target
= control target key end

     0   :  { %v1110_v1 = vmov 0.0   ;;  %vm1111_vm0 = vmmov 0   ;;  %v1112_v3 = vmov 0   ;;  %vm63_vm1 = vcmask 261120   ;;  %s1115_s20 = smov 32   ;;  %s1116_s23 = smov 96   ;;  %s1628_s2 = inlined_call_operand.vmem [shape: bf16[32,128], index: 2, kind: input, shape index: {}]   ;;  %s1629_s0 = inlined_call_operand.vmem [shape: f32[8,8,32], index: 0, kind: input, shape index: {}]   ;;  %s1630_s3 = inlined_call_operand.vmem [shape: bf16[32,128], index: 3, kind: input, shape index: {}]   ;;  %s1631_s4 = inlined_call_operand.vmem [shape: f32[1,128], index: 4, kind: input, shape index: {}]   ;;  %s1632_s1 = inlined_call_operand.vmem [shape: s32[8,1], index: 1, kind: input, shape index: {}]   ;;  %s1633_s5 = inlined_call_operand.vmem [shape: f32[8,256], index: 5, kind: output, shape index: {0}]   ;;  %s1634_s6 = inlined_call_operand.vmem [shape: f32[8,32], index: 6, kind: output, shape index: {1}]  }
   0x1   :  { %v1074_v0 = vld [vmem:[%s1628_s2 + $0x8] sm:$0xff]   ;;  %994 = vmatprep.subr.bf16.mxu1 %v1110_v1  ;;  %998 = vmatprep.mubr.msk.bf16.mxu1 %vm1111_vm0, %v1110_v1  ;;  %v1075_v2 = vld [vmem:[%s1628_s2] sm:$0xff]   ;;  %v31_v6 = vld [vmem:[%s1629_s0 + $0x10] sm:$0xff]  ;;  %v141_v18 = vlaneseq  ;;  %v1113_v47 = vmov 0.5   ;;  %vm257_vm9 = vcmask 130048  }
   0x2   :  { %1072 = vset.pattern.permute.xlu1 %v1112_v3  ;;  %1073 = vset.pattern.permute.xlu0 %v1112_v3  ;;  %v29_v4 = vld [vmem:[%s1629_s0] sm:$0xff]  ;;  %v30_v5 = vld [vmem:[%s1629_s0 + $0x8] sm:$0xff]  ;;  %v32_v8 = vld [vmem:[%s1629_s0 + $0x18] sm:$0xff] }
   0x3   :  { %982 = vmatprep.subr.bf16.mxu0 %v1074_v0  ;;  %v37_v7 = vpack.c.bf16 %v30_v5, %v29_v4  ;;  %v1185_v9 = vld [vmem:[%s1630_s3 + $0x8] sm:$0xff]   ;;  %v33_v10 = vld [vmem:[%s1629_s0 + $0x20] sm:$0xff]  ;;  %v38_v12 = vpack.c.bf16 %v32_v8, %v31_v6  ;;  %v35_v15 = vld [vmem:[%s1629_s0 + $0x30] sm:$0xff]  ;;  %v1229_v21 = vand.u32 127, %v141_v18 }
   0x4   :  { %983 = vmatpush3.bf16.msra.mxu0 %v1074_v0  ;;  %v34_v11 = vld [vmem:[%s1629_s0 + $0x28] sm:$0xff]  ;;  %995 = vmatpush3.bf16.msra.mxu1 %v1185_v9  ;;  %v1198_v13 = vld [vmem:[%s1630_s3] sm:$0xff]   ;;  %v36_v16 = vld [vmem:[%s1629_s0 + $0x38] sm:$0xff] }
   0x5   :  { %984 = vmatprep.subr.bf16.mxu0 %v1075_v2  ;;  %986 = vmatprep.mubr.msk.bf16.mxu0 %vm63_vm1, %v37_v7  ;;  %v39_v14 = vpack.c.bf16 %v34_v11, %v33_v10  ;;  %v40_v17 = vpack.c.bf16 %v36_v16, %v35_v15  ;;  %v936_v19 = vld [vmem:[%s1631_s4] ss:$0 sm:$0xff]  ;;  %v152_v26 = vand.u32 31, %v1229_v21  ;;  %vm143_vm3 = vcmp.ge.s32.totalorder %v1229_v21, 64  ;;  %s1114_s4 = smov 64  }
   0x6   :  { %996 = vmatprep.subr.bf16.mxu1 %v1110_v1  ;;  %vm144_vm4 = vcmp.lt.s32.totalorder %v1229_v21, 96  ;;  %v23_v4 = vld [vmem:[%s1632_s1] sm:$0xff]  ;;  %vm161_vm6 = vcmp.lt.s32.totalorder %v1229_v21, 16  ;;  %v1117_v7 = vmov 7  }
   0x7   :  { %vm1238_vm2 = vcmp.lt.s32.totalorder %v152_v26, 16  ;;  %vm1256_vm5 = vmand %vm143_vm3, %vm144_vm4  ;;  %v243_v8 = vsel %vm161_vm6, 0, %v1117_v7 }
   0x8   :  { %985 = vmatpush3.bf16.msra.mxu0 %v1075_v2  ;;  %997 = vmatpush3.bf16.msra.mxu1 %v1198_v13  ;;  %v1274_v48 = vsel %vm1256_vm5, 1.0, %v1113_v47  ;;  %v1297_v57 = vsel %vm1256_vm5, 0.0, %v1113_v47 }
   0x9   :  { %1010 = vmatprep.subr.bf16.mxu0 %v1110_v1  ;;  %1002 = vmatprep.subr.bf16.mxu1 %v1110_v1 }
   0xb   :  { %987 = vmatmul.mubr.msk.bf16.vlgmr.msra.gmra.mxu0 %vm63_vm1, %v38_v12  ;;  %999 = vmatmul.mubr.bf16.vlgmr.msra.gmra.mxu1 %v1112_v3 }
   0xc   :  { %990 = vmatprep.mubr.msk.bf16.mxu0 %vm63_vm1, %v39_v14  ;;  %1011 = vmatpush3.bf16.msra.mxu0 %v1185_v9 }
   0xd   :  { %1012 = vmatprep.subr.bf16.mxu0 %v1110_v1  ;;  %1003 = vmatpush3.bf16.msra.mxu1 %v1185_v9 }
   0xe   :  { %1006 = vmatprep.mubr.msk.bf16.mxu1 %vm1111_vm0, %v1110_v1  ;;  %1004 = vmatprep.subr.bf16.mxu1 %v1110_v1 }
  0x10   :  { %1013 = vmatpush3.bf16.msra.mxu0 %v1198_v13 }
  0x11   :  { %1026 = vmatprep.subr.bf16.mxu0 %v1110_v1  ;;  %1005 = vmatpush3.bf16.msra.mxu1 %v1198_v13 }
  0x12   :  { %1018 = vmatprep.subr.bf16.mxu1 %v1110_v1 }
  0x13   :  { %991 = vmatmul.mubr.msk.bf16.gmra.mxu0 %vm63_vm1, %v40_v17 }
  0x14   :  { %1014 = vmatprep.mubr.msk.bf16.mxu0 %vm1111_vm0, %v1110_v1 }
  0xcb   :  { %v988_v20 = vpop.f32.mrf.mxu0  ;;  %v215_v24 = vpop.f32.mrf.mxu1 }
  0xcc   :  { %v1231_v22 = vadd.f32 %v988_v20, %v936_v19 }
  0xcd   :  { %v110_v23 = vpop.f32.mrf.mxu0  ;;  %v1000_v28 = vpop.f32.mrf.mxu1 }
  0xce   :  { %v1260_v42 = vadd.f32 %v936_v19, %v110_v23 }
  0xcf   :  { %v989_v25 = vpop.f32.mrf.mxu0  ;;  %v218_v31 = vpop.f32.mrf.mxu1 }
  0xd0   :  { %v1234_v27 = vadd.f32 %v989_v25, %v936_v19 }
  0xd1   :  { %v113_v29 = vpop.f32.mrf.mxu0  ;;  %v1001_v35 = vpop.f32.mrf.mxu1 }
  0xd2   :  { %v1236_v30 = vadd.f32 %v936_v19, %v113_v29 }
  0xd3   :  { %v992_v32 = vpop.f32.mrf.mxu0 }
  0xd4   :  { %v1242_v34 = vadd.f32 %v992_v32, %v936_v19 }
  0xd5   :  { %v126_v36 = vpop.f32.mrf.mxu0 }
  0xd6   :  { %v1246_v37 = vadd.f32 %v936_v19, %v126_v36  ;;  %v267_v38 = vsel %vm1238_vm2, %v1236_v30, %v1242_v34  ;;  %v746_v39 = vsel %vm1238_vm2, %v1242_v34, %v1236_v30 }
  0xd7   :  { %v993_v40 = vpop.f32.mrf.mxu0 }
  0xd8   :  { %v1262_v43 = vadd.f32 %v993_v40, %v936_v19  ;;  %v465_v44 = vsel %vm1238_vm2, %v1234_v27, %v1246_v37  ;;  %v560_v45 = vsel %vm1238_vm2, %v1246_v37, %v1234_v27 }
  0xd9   :  { %v129_v46 = vpop.f32.mrf.mxu0 }
  0xda   :  { %v165_v49 = vsel %vm1238_vm2, %v1260_v42, %v1262_v43  ;;  %v1280_v50 = vadd.f32 %v936_v19, %v129_v46  ;;  %v841_v51 = vsel %vm1238_vm2, %v1262_v43, %v1260_v42 }
  0xdb   :  { %v221_v52 = vadd.f32 %v215_v24, %v165_v49  ;;  %v1118_v49 = vmov 6  }
  0xdc   :  { %v366_v53 = vsel %vm1238_vm2, %v1231_v22, %v1280_v50  ;;  %v651_v54 = vsel %vm1238_vm2, %v1280_v50, %v1231_v22 }
  0xdd   :  { %v222_v55 = vmul.f32 %v221_v52, %v1274_v48  ;;  %v338_v52 = vsel %vm161_vm6, 1, %v1118_v49 }
  0xdf   :  { %1078 = vtanh.f32 %v222_v55 }
  0xec   :  { %v1079_v56 = vpop.eup %1078 }
  0xed   :  { %v224_v58 = vmul.f32 %v1079_v56, %v1274_v48 }
  0xef   :  { %v225_v59 = vadd.f32 %v224_v58, %v1297_v57 }
  0xf1   :  { %228 = vrot.lane.b32.xlu0 %v225_v59, %s1114_s4  ;;  %v226_v62 = vmul.f32 0.0, %v225_v59 }
 0x163   :  { %v229_v60 = vpop.permute.xlu0 %228 }
 0x164   :  { %v231_v61 = vmul.f32 %v229_v60, %v225_v59 }
 0x166   :  { %233 = vrot.lane.b32.xlu0 %v231_v61, %s1115_s20 }
 0x1d8   :  { %v234_v63 = vpop.permute.xlu0 %233 }
 0x1d9   :  { %v236_v0 = vadd.f32 %v234_v63, %v226_v62 }
 0x1db   :  { %1080 = vtanh.f32 %v236_v0 }
 0x1e8   :  { %v1081_v2 = vpop.eup %1080 }
 0x1e9   :  { %239 = vrot.lane.b32.xlu1 %v1081_v2, %s1114_s4 }
 0x1ed   :  { %163 = vperm.xlu1 %1072, %v23_v4  }
 0x1f1   :  { %251 = vrot.lane.b32.xlu1 %v236_v0, %s1116_s23 }
 0x25b   :  { %v240_v5 = vpop.permute.xlu1 %239 }
 0x25c   :  { %v242_v6 = vmul.f32 %v240_v5, %v225_v59 }
 0x25e   :  { %246 = vrot.lane.b32.xlu0 %v242_v6, %s1115_s20 }
 0x268   :  { %v1312_v10 = vpop.permute.xlu1 %163 }
 0x269   :  { %vm244_vm7 = vcmp.gt.s32.totalorder %v1312_v10, %v243_v8  ;;  %vm255_vm8 = vcmp.gt.s32.totalorder %v1312_v10, 0  ;;  %vm339_vm10 = vcmp.gt.s32.totalorder %v1312_v10, %v338_v52  ;;  %vm358_vm2 = vcmp.gt.s32.totalorder %v1312_v10, 6 }
 0x26a   :  { %vm457_vm3 = vcmp.gt.s32.totalorder %v1312_v10, 5  ;;  %vm548_vm4 = vcmp.gt.s32.totalorder %v1312_v10, 3  ;;  %vm449_vm5 = vcmp.gt.s32.totalorder %v1312_v10, 2 }
 0x26c   :  { %v252_v11 = vpop.permute.xlu1 %251 }
 0x26d   :  { %v254_v12 = vsel %vm244_vm7, %v252_v11, 0.0 }
 0x26e   :  { %318 = vrot.lane.b32.xlu1 %v254_v12, %s1115_s20 }
 0x2d0   :  { %v247_v14 = vpop.permute.xlu0 %246 }
 0x2d1   :  { %v1317_v15 = vsel %vm244_vm7, %v247_v14, 0.0  ;;  %vm350_vm7 = vcmp.gt.s32.totalorder %v1312_v10, 1 }
 0x2d2   :  { %v256_v16 = vsel %vm255_vm8, %v1317_v15, 0.0  ;;  %v268_v17 = vpack.c.bf16 %v1317_v15, %v1317_v15 }
 0x2d3   :  { %258 = vst.msk [vmem:[%s1633_s5] sm:$0xff] %vm257_vm9, %v256_v16 }
 0x2d4   :  { %1007 = vmatmul.mubr.msk.bf16.vlgmr.msra.gmra.mxu1 %vm63_vm1, %v268_v17 }
 0x2d5   :  { %1019 = vmatpush3.bf16.msra.mxu1 %v1185_v9  ;;  %1022 = vmatprep.mubr.msk.bf16.mxu1 %vm1111_vm0, %v1110_v1 }
 0x2d6   :  { %1020 = vmatprep.subr.bf16.mxu1 %v1110_v1 }
 0x2d9   :  { %1021 = vmatpush3.bf16.msra.mxu1 %v1198_v13 }
 0x2da   :  { %1034 = vmatprep.subr.bf16.mxu1 %v1110_v1 }
 0x2e0   :  { %v319_v35 = vpop.permute.xlu1 %318 }
 0x394   :  { %v306_v18 = vpop.f32.mrf.mxu1 }
 0x395   :  { %v312_v19 = vadd.f32 %v306_v18, %v267_v38 }
 0x396   :  { %v1008_v20 = vpop.f32.mrf.mxu1 }
 0x397   :  { %v313_v23 = vmul.f32 %v312_v19, %v1274_v48  ;;  %v1119_v20 = vmov 5  }
 0x398   :  { %v309_v24 = vpop.f32.mrf.mxu1 }
 0x399   :  { %1082 = vtanh.f32 %v313_v23  ;;  %v437_v23 = vsel %vm161_vm6, 2, %v1119_v20 }
 0x39a   :  { %v1009_v25 = vpop.f32.mrf.mxu1  ;;  %vm438_vm11 = vcmp.gt.s32.totalorder %v1312_v10, %v437_v23 }
 0x3a6   :  { %v1083_v26 = vpop.eup %1082 }
 0x3a7   :  { %v315_v28 = vmul.f32 %v1083_v26, %v1274_v48 }
 0x3a9   :  { %v316_v29 = vadd.f32 %v315_v28, %v1297_v57 }
 0x3ab   :  { %323 = vrot.lane.b32.xlu0 %v316_v29, %s1114_s4  ;;  %v321_v36 = vmul.f32 %v319_v35, %v316_v29 }
 0x41d   :  { %v324_v31 = vpop.permute.xlu0 %323 }
 0x41e   :  { %v326_v32 = vmul.f32 %v324_v31, %v316_v29 }
 0x420   :  { %328 = vrot.lane.b32.xlu0 %v326_v32, %s1115_s20 }
 0x492   :  { %v329_v38 = vpop.permute.xlu0 %328 }
 0x493   :  { %v331_v40 = vadd.f32 %v329_v38, %v321_v36 }
 0x495   :  { %1084 = vtanh.f32 %v331_v40 }
 0x4a2   :  { %v1085_v41 = vpop.eup %1084 }
 0x4a3   :  { %334 = vrot.lane.b32.xlu1 %v1085_v41, %s1114_s4 }
 0x4a7   :  { %346 = vrot.lane.b32.xlu1 %v331_v40, %s1116_s23 }
 0x515   :  { %v335_v46 = vpop.permute.xlu1 %334 }
 0x516   :  { %v337_v47 = vmul.f32 %v335_v46, %v316_v29 }
 0x518   :  { %341 = vrot.lane.b32.xlu0 %v337_v47, %s1115_s20 }
 0x519   :  { %v347_v55 = vpop.permute.xlu1 %346 }
 0x51a   :  { %v349_v56 = vsel %vm339_vm10, %v347_v55, %v254_v12 }
 0x51b   :  { %417 = vrot.lane.b32.xlu1 %v349_v56, %s1115_s20 }
 0x58a   :  { %v342_v58 = vpop.permute.xlu0 %341 }
 0x58b   :  { %v1353_v59 = vsel %vm339_vm10, %v342_v58, %v1317_v15  ;;  %vm265_vm10 = vcmask 1048448  }
 0x58c   :  { %v367_v60 = vpack.c.bf16 %v1353_v59, %v1353_v59 }
 0x58d   :  { %v418_v12 = vpop.permute.xlu1 %417 }
 0x58e   :  { %1015 = vmatmul.mubr.msk.bf16.vlgmr.msra.gmra.mxu0 %vm63_vm1, %v367_v60 }
 0x58f   :  { %1027 = vmatpush3.bf16.msra.mxu0 %v1185_v9  ;;  %1030 = vmatprep.mubr.msk.bf16.mxu0 %vm1111_vm0, %v1110_v1 }
 0x590   :  { %1028 = vmatprep.subr.bf16.mxu0 %v1110_v1 }
 0x593   :  { %1029 = vmatpush3.bf16.msra.mxu0 %v1198_v13 }
 0x594   :  { %1042 = vmatprep.subr.bf16.mxu0 %v1110_v1 }
 0x64e   :  { %v405_v61 = vpop.f32.mrf.mxu0 }
 0x64f   :  { %v411_v62 = vadd.f32 %v405_v61, %v366_v53 }
 0x650   :  { %v1016_v63 = vpop.f32.mrf.mxu0 }
 0x651   :  { %v412_v0 = vmul.f32 %v411_v62, %v1274_v48  ;;  %v1120_v63 = vmov 4  }
 0x652   :  { %v408_v2 = vpop.f32.mrf.mxu0 }
 0x653   :  { %1086 = vtanh.f32 %v412_v0  ;;  %v536_v0 = vsel %vm161_vm6, 3, %v1120_v63 }
 0x654   :  { %v1017_v4 = vpop.f32.mrf.mxu0  ;;  %vm537_vm12 = vcmp.gt.s32.totalorder %v1312_v10, %v536_v0  ;;  %v1122_v0 = vmov 2  }
 0x660   :  { %v1087_v5 = vpop.eup %1086 }
 0x661   :  { %v414_v6 = vmul.f32 %v1087_v5, %v1274_v48 }
 0x663   :  { %v415_v7 = vadd.f32 %v414_v6, %v1297_v57 }
 0x665   :  { %422 = vrot.lane.b32.xlu0 %v415_v7, %s1114_s4  ;;  %v420_v14 = vmul.f32 %v418_v12, %v415_v7 }
 0x6d7   :  { %v423_v8 = vpop.permute.xlu0 %422 }
 0x6d8   :  { %v425_v11 = vmul.f32 %v423_v8, %v415_v7 }
 0x6da   :  { %427 = vrot.lane.b32.xlu0 %v425_v11, %s1115_s20 }
 0x74c   :  { %v428_v53 = vpop.permute.xlu0 %427 }
 0x74d   :  { %v430_v16 = vadd.f32 %v428_v53, %v420_v14 }
 0x74f   :  { %1088 = vtanh.f32 %v430_v16 }
 0x75c   :  { %v1089_v17 = vpop.eup %1088 }
 0x75d   :  { %433 = vrot.lane.b32.xlu1 %v1089_v17, %s1114_s4 }
 0x761   :  { %445 = vrot.lane.b32.xlu1 %v430_v16, %s1116_s23 }
 0x7cf   :  { %v434_v18 = vpop.permute.xlu1 %433 }
 0x7d0   :  { %v436_v19 = vmul.f32 %v434_v18, %v415_v7 }
 0x7d2   :  { %440 = vrot.lane.b32.xlu0 %v436_v19, %s1115_s20 }
 0x7d3   :  { %v446_v24 = vpop.permute.xlu1 %445 }
 0x7d4   :  { %v448_v25 = vsel %vm438_vm11, %v446_v24, %v349_v56 }
 0x7d5   :  { %516 = vrot.lane.b32.xlu1 %v448_v25, %s1115_s20 }
 0x844   :  { %v441_v26 = vpop.permute.xlu0 %440 }
 0x845   :  { %v1382_v28 = vsel %vm438_vm11, %v441_v26, %v1353_v59  ;;  %vm364_vm11 = vcmask 786048  }
 0x846   :  { %v466_v29 = vpack.c.bf16 %v1382_v28, %v1382_v28 }
 0x847   :  { %v517_v55 = vpop.permute.xlu1 %516 }
 0x848   :  { %1023 = vmatmul.mubr.msk.bf16.vlgmr.msra.gmra.mxu1 %vm63_vm1, %v466_v29 }
 0x849   :  { %1035 = vmatpush3.bf16.msra.mxu1 %v1185_v9  ;;  %1038 = vmatprep.mubr.msk.bf16.mxu1 %vm1111_vm0, %v1110_v1 }
 0x84a   :  { %1036 = vmatprep.subr.bf16.mxu1 %v1110_v1 }
 0x84d   :  { %1037 = vmatpush3.bf16.msra.mxu1 %v1198_v13 }
 0x84e   :  { %1050 = vmatprep.subr.bf16.mxu1 %v1110_v1 }
 0x908   :  { %v504_v31 = vpop.f32.mrf.mxu1 }
 0x909   :  { %v510_v32 = vadd.f32 %v504_v31, %v465_v44  ;;  %v1121_v31 = vmov 3  }
 0x90a   :  { %v1024_v35 = vpop.f32.mrf.mxu1 }
 0x90b   :  { %v511_v36 = vmul.f32 %v510_v32, %v1274_v48  ;;  %v631_v32 = vsel %vm161_vm6, 4, %v1121_v31 }
 0x90c   :  { %v507_v38 = vpop.f32.mrf.mxu1  ;;  %vm632_vm13 = vcmp.gt.s32.totalorder %v1312_v10, %v631_v32 }
 0x90d   :  { %1090 = vtanh.f32 %v511_v36 }
 0x90e   :  { %v1025_v40 = vpop.f32.mrf.mxu1 }
 0x91a   :  { %v1091_v41 = vpop.eup %1090 }
 0x91b   :  { %v513_v46 = vmul.f32 %v1091_v41, %v1274_v48 }
 0x91d   :  { %v514_v47 = vadd.f32 %v513_v46, %v1297_v57 }
 0x91f   :  { %521 = vrot.lane.b32.xlu0 %v514_v47, %s1114_s4  ;;  %v519_v56 = vmul.f32 %v517_v55, %v514_v47 }
 0x991   :  { %v522_v49 = vpop.permute.xlu0 %521 }
 0x992   :  { %v524_v52 = vmul.f32 %v522_v49, %v514_v47 }
 0x994   :  { %526 = vrot.lane.b32.xlu0 %v524_v52, %s1115_s20 }
 0xa06   :  { %v527_v44 = vpop.permute.xlu0 %526 }
 0xa07   :  { %v529_v58 = vadd.f32 %v527_v44, %v519_v56 }
 0xa09   :  { %1092 = vtanh.f32 %v529_v58 }
 0xa16   :  { %v1093_v60 = vpop.eup %1092 }
 0xa17   :  { %532 = vrot.lane.b32.xlu1 %v1093_v60, %s1114_s4 }
 0xa1b   :  { %544 = vrot.lane.b32.xlu1 %v529_v58, %s1116_s23 }
 0xa89   :  { %v533_v61 = vpop.permute.xlu1 %532 }
 0xa8a   :  { %v535_v62 = vmul.f32 %v533_v61, %v514_v47 }
 0xa8c   :  { %539 = vrot.lane.b32.xlu0 %v535_v62, %s1115_s20 }
 0xa8d   :  { %v545_v2 = vpop.permute.xlu1 %544 }
 0xa8e   :  { %v547_v4 = vsel %vm537_vm12, %v545_v2, %v448_v25  ;;  %v722_v2 = vsel %vm161_vm6, 5, %v1122_v0  ;;  %v351_v0 = vsel %vm350_vm7, %v1353_v59, 0.0 }
 0xa8f   :  { %611 = vrot.lane.b32.xlu1 %v547_v4, %s1115_s20  ;;  %vm723_vm14 = vcmp.gt.s32.totalorder %v1312_v10, %v722_v2 }
 0xafe   :  { %v540_v5 = vpop.permute.xlu0 %539 }
 0xaff   :  { %v1411_v6 = vsel %vm537_vm12, %v540_v5, %v1382_v28  ;;  %vm463_vm12 = vcmask 523648  }
 0xb00   :  { %v561_v7 = vpack.c.bf16 %v1411_v6, %v1411_v6 }
 0xb01   :  { %v612_v24 = vpop.permute.xlu1 %611 }
 0xb02   :  { %1031 = vmatmul.mubr.msk.bf16.vlgmr.msra.gmra.mxu0 %vm63_vm1, %v561_v7 }
 0xb03   :  { %1043 = vmatpush3.bf16.msra.mxu0 %v1185_v9  ;;  %1046 = vmatprep.mubr.msk.bf16.mxu0 %vm1111_vm0, %v1110_v1 }
 0xb04   :  { %1044 = vmatprep.subr.bf16.mxu0 %v1110_v1 }
 0xb07   :  { %1045 = vmatpush3.bf16.msra.mxu0 %v1198_v13 }
 0xbc2   :  { %v599_v8 = vpop.f32.mrf.mxu0 }
 0xbc3   :  { %v605_v11 = vadd.f32 %v599_v8, %v560_v45 }
 0xbc4   :  { %v1032_v12 = vpop.f32.mrf.mxu0 }
 0xbc5   :  { %v606_v14 = vmul.f32 %v605_v11, %v1274_v48 }
 0xbc6   :  { %v602_v53 = vpop.f32.mrf.mxu0 }
 0xbc7   :  { %1094 = vtanh.f32 %v606_v14 }
 0xbc8   :  { %v1033_v16 = vpop.f32.mrf.mxu0 }
 0xbd4   :  { %v1095_v17 = vpop.eup %1094 }
 0xbd5   :  { %v608_v18 = vmul.f32 %v1095_v17, %v1274_v48 }
 0xbd7   :  { %v609_v19 = vadd.f32 %v608_v18, %v1297_v57 }
 0xbd9   :  { %616 = vrot.lane.b32.xlu0 %v609_v19, %s1114_s4  ;;  %v614_v27 = vmul.f32 %v612_v24, %v609_v19 }
 0xc4b   :  { %v617_v20 = vpop.permute.xlu0 %616 }
 0xc4c   :  { %v619_v23 = vmul.f32 %v617_v20, %v609_v19 }
 0xc4e   :  { %621 = vrot.lane.b32.xlu0 %v619_v23, %s1115_s20 }
 0xcc0   :  { %v622_v37 = vpop.permute.xlu0 %621 }
 0xcc1   :  { %v624_v45 = vadd.f32 %v622_v37, %v614_v27 }
 0xcc3   :  { %1096 = vtanh.f32 %v624_v45 }
 0xcd0   :  { %v1097_v25 = vpop.eup %1096 }
 0xcd1   :  { %627 = vrot.lane.b32.xlu1 %v1097_v25, %s1114_s4 }
 0xcd5   :  { %639 = vrot.lane.b32.xlu1 %v624_v45, %s1116_s23 }
 0xd43   :  { %v628_v26 = vpop.permute.xlu1 %627 }
 0xd44   :  { %v630_v29 = vmul.f32 %v628_v26, %v609_v19 }
 0xd46   :  { %634 = vrot.lane.b32.xlu0 %v630_v29, %s1115_s20  ;;  %v1123_v29 = vmov 1  }
 0xd47   :  { %v640_v35 = vpop.permute.xlu1 %639  ;;  %v817_v31 = vsel %vm161_vm6, 6, %v1123_v29 }
 0xd48   :  { %v642_v36 = vsel %vm632_vm13, %v640_v35, %v547_v4  ;;  %vm818_vm15 = vcmp.gt.s32.totalorder %v1312_v10, %v817_v31 }
 0xd49   :  { %702 = vrot.lane.b32.xlu1 %v642_v36, %s1115_s20 }
 0xdb8   :  { %v635_v38 = vpop.permute.xlu0 %634 }
 0xdb9   :  { %v1439_v40 = vsel %vm632_vm13, %v635_v38, %v1411_v6  ;;  %vm558_vm13 = vcmask 261248  }
 0xdba   :  { %v652_v41 = vpack.c.bf16 %v1439_v40, %v1439_v40 }
 0xdbb   :  { %v703_v60 = vpop.permute.xlu1 %702 }
 0xdbc   :  { %1039 = vmatmul.mubr.msk.bf16.vlgmr.msra.gmra.mxu1 %vm63_vm1, %v652_v41 }
 0xdbd   :  { %1051 = vmatpush3.bf16.msra.mxu1 %v1185_v9  ;;  %1054 = vmatprep.mubr.msk.bf16.mxu1 %vm1111_vm0, %v1110_v1  ;;  %vm259_vm0 = vcmp.gt.s32.totalorder %v1312_v10, 7 }
 0xdbe   :  { %1052 = vmatprep.subr.bf16.mxu1 %v1110_v1 }
 0xdc1   :  { %1053 = vmatpush3.bf16.msra.mxu1 %v1198_v13 }
 0xe7c   :  { %v690_v46 = vpop.f32.mrf.mxu1 }
 0xe7d   :  { %v696_v47 = vadd.f32 %v690_v46, %v651_v54 }
 0xe7e   :  { %v1040_v49 = vpop.f32.mrf.mxu1 }
 0xe7f   :  { %v697_v52 = vmul.f32 %v696_v47, %v1274_v48 }
 0xe80   :  { %v693_v55 = vpop.f32.mrf.mxu1 }
 0xe81   :  { %1098 = vtanh.f32 %v697_v52 }
 0xe82   :  { %v1041_v9 = vpop.f32.mrf.mxu1 }
 0xe8e   :  { %v1099_v56 = vpop.eup %1098 }
 0xe8f   :  { %v699_v44 = vmul.f32 %v1099_v56, %v1274_v48 }
 0xe91   :  { %v700_v1 = vadd.f32 %v699_v44, %v1297_v57 }
 0xe93   :  { %707 = vrot.lane.b32.xlu0 %v700_v1, %s1114_s4  ;;  %v705_v22 = vmul.f32 %v703_v60, %v700_v1 }
 0xf05   :  { %v708_v13 = vpop.permute.xlu0 %707 }
 0xf06   :  { %v710_v58 = vmul.f32 %v708_v13, %v700_v1 }
 0xf08   :  { %712 = vrot.lane.b32.xlu0 %v710_v58, %s1115_s20 }
 0xf7a   :  { %v713_v50 = vpop.permute.xlu0 %712 }
 0xf7b   :  { %v715_v54 = vadd.f32 %v713_v50, %v705_v22  ;;  %v458_v22 = vsel %vm457_vm3, %v1382_v28, 0.0 }
 0xf7d   :  { %1100 = vtanh.f32 %v715_v54 }
 0xf8a   :  { %v1101_v61 = vpop.eup %1100 }
 0xf8b   :  { %718 = vrot.lane.b32.xlu1 %v1101_v61, %s1114_s4 }
 0xf8f   :  { %730 = vrot.lane.b32.xlu1 %v715_v54, %s1116_s23 }
 0xffd   :  { %v719_v62 = vpop.permute.xlu1 %718 }
 0xffe   :  { %v721_v63 = vmul.f32 %v719_v62, %v700_v1 }
0x1000   :  { %725 = vrot.lane.b32.xlu0 %v721_v63, %s1115_s20 }
0x1001   :  { %v731_v4 = vpop.permute.xlu1 %730 }
0x1002   :  { %v733_v5 = vsel %vm723_vm14, %v731_v4, %v642_v36  ;;  %v450_v4 = vsel %vm449_vm5, %v1382_v28, 0.0  ;;  %v549_v28 = vsel %vm548_vm4, %v1411_v6, 0.0 }
0x1003   :  { %797 = vrot.lane.b32.xlu1 %v733_v5, %s1115_s20 }
0x1072   :  { %v726_v7 = vpop.permute.xlu0 %725 }
0x1073   :  { %v1467_v8 = vsel %vm723_vm14, %v726_v7, %v1439_v40  ;;  %vm556_vm14 = vcmp.gt.s32.totalorder %v1312_v10, 4 }
0x1074   :  { %v747_v11 = vpack.c.bf16 %v1467_v8, %v1467_v8  ;;  %v740_v50 = vsel %vm449_vm5, %v1467_v8, 0.0  ;;  %v643_v7 = vsel %vm556_vm14, %v1439_v40, 0.0 }
0x1075   :  { %v798_v37 = vpop.permute.xlu1 %797 }
0x1076   :  { %1047 = vmatmul.mubr.msk.bf16.vlgmr.msra.gmra.mxu0 %vm63_vm1, %v747_v11 }
0x1136   :  { %v785_v12 = vpop.f32.mrf.mxu0 }
0x1137   :  { %v791_v14 = vadd.f32 %v785_v12, %v746_v39 }
0x1138   :  { %v1048_v53 = vpop.f32.mrf.mxu0 }
0x1139   :  { %v792_v16 = vmul.f32 %v791_v14, %v1274_v48 }
0x113a   :  { %v788_v17 = vpop.f32.mrf.mxu0 }
0x113b   :  { %1102 = vtanh.f32 %v792_v16 }
0x113c   :  { %v1049_v18 = vpop.f32.mrf.mxu0 }
0x1148   :  { %v1103_v19 = vpop.eup %1102 }
0x1149   :  { %v794_v20 = vmul.f32 %v1103_v19, %v1274_v48 }
0x114b   :  { %v795_v23 = vadd.f32 %v794_v20, %v1297_v57 }
0x114d   :  { %802 = vrot.lane.b32.xlu0 %v795_v23, %s1114_s4  ;;  %v800_v30 = vmul.f32 %v798_v37, %v795_v23 }
0x11bf   :  { %v803_v24 = vpop.permute.xlu0 %802 }
0x11c0   :  { %v805_v27 = vmul.f32 %v803_v24, %v795_v23 }
0x11c2   :  { %807 = vrot.lane.b32.xlu0 %v805_v27, %s1115_s20 }
0x1234   :  { %v808_v34 = vpop.permute.xlu0 %807 }
0x1235   :  { %v810_v39 = vadd.f32 %v808_v34, %v800_v30 }
0x1237   :  { %1104 = vtanh.f32 %v810_v39 }
0x1244   :  { %v1105_v45 = vpop.eup %1104 }
0x1245   :  { %813 = vrot.lane.b32.xlu1 %v1105_v45, %s1114_s4 }
0x1249   :  { %825 = vrot.lane.b32.xlu1 %v810_v39, %s1116_s23 }
0x12b7   :  { %v814_v25 = vpop.permute.xlu1 %813 }
0x12b8   :  { %v816_v26 = vmul.f32 %v814_v25, %v795_v23 }
0x12ba   :  { %820 = vrot.lane.b32.xlu0 %v816_v26, %s1115_s20 }
0x12bb   :  { %v826_v32 = vpop.permute.xlu1 %825 }
0x12bc   :  { %v828_v35 = vsel %vm818_vm15, %v826_v32, %v733_v5  ;;  %v557_v5 = vsel %vm556_vm14, %v1411_v6, 0.0  ;;  %v912_v6 = vsel %vm161_vm6, 7, %v1112_v3  ;;  %vm455_vm6 = vcmask 654848  }
0x12bd   :  { %892 = vrot.lane.b32.xlu1 %v828_v35, %s1115_s20 }
0x132c   :  { %v821_v36 = vpop.permute.xlu0 %820 }
0x132d   :  { %v1490_v38 = vsel %vm818_vm15, %v821_v36, %v1467_v8  ;;  %vm356_vm15 = vcmask 392448  }
0x132e   :  { %v842_v41 = vpack.c.bf16 %v1490_v38, %v1490_v38  ;;  %v835_v54 = vsel %vm350_vm7, %v1490_v38, 0.0  ;;  %v829_v11 = vsel %vm358_vm2, %v1490_v38, 0.0 }
0x132f   :  { %v893_v33 = vpop.permute.xlu1 %892 }
0x1330   :  { %1055 = vmatmul.mubr.msk.bf16.vlgmr.msra.gmra.mxu1 %vm63_vm1, %v842_v41 }
0x13f0   :  { %v880_v46 = vpop.f32.mrf.mxu1 }
0x13f1   :  { %v886_v47 = vadd.f32 %v880_v46, %v841_v51 }
0x13f2   :  { %v1056_v49 = vpop.f32.mrf.mxu1 }
0x13f3   :  { %v887_v52 = vmul.f32 %v886_v47, %v1274_v48 }
0x13f4   :  { %v883_v55 = vpop.f32.mrf.mxu1 }
0x13f5   :  { %1106 = vtanh.f32 %v887_v52 }
0x13f6   :  { %v1057_v9 = vpop.f32.mrf.mxu1 }
0x1402   :  { %v1107_v56 = vpop.eup %1106 }
0x1403   :  { %v889_v44 = vmul.f32 %v1107_v56, %v1274_v48  ;;  %v260_v48 = vsel %vm259_vm0, %v1317_v15, 0.0  ;;  %v645_v15 = vsel %vm548_vm4, %v1439_v40, 0.0  ;;  %v734_v40 = vsel %vm457_vm3, %v1467_v8, 0.0 }
0x1405   :  { %v890_v1 = vadd.f32 %v889_v44, %v1297_v57  ;;  %v359_v57 = vsel %vm358_vm2, %v1353_v59, 0.0 }
0x1407   :  { %897 = vrot.lane.b32.xlu0 %v890_v1, %s1114_s4  ;;  %v895_v42 = vmul.f32 %v893_v33, %v890_v1 }
0x1479   :  { %v898_v13 = vpop.permute.xlu0 %897 }
0x147a   :  { %v900_v58 = vmul.f32 %v898_v13, %v890_v1 }
0x147c   :  { %902 = vrot.lane.b32.xlu0 %v900_v58, %s1115_s20 }
0x14ee   :  { %v903_v43 = vpop.permute.xlu0 %902 }
0x14ef   :  { %v905_v51 = vadd.f32 %v903_v43, %v895_v42 }
0x14f1   :  { %1108 = vtanh.f32 %v905_v51 }
0x14fe   :  { %v1109_v60 = vpop.eup %1108 }
0x14ff   :  { %908 = vrot.lane.b32.xlu1 %v1109_v60, %s1114_s4 }
0x1503   :  { %262 = vrot.lane.b32.xlu1 %v260_v48, %s1116_s23 }
0x1507   :  { %361 = vrot.lane.b32.xlu1 %v359_v57, %s1114_s4 }
0x150b   :  { %460 = vrot.lane.b32.xlu1 %v458_v22, %s1115_s20 }
0x150f   :  { %647 = vrot.lane.b32.xlu1 %v645_v15, %s1116_s23 }
0x1513   :  { %742 = vrot.lane.b32.xlu1 %v740_v50, %s1114_s4 }
0x1517   :  { %837 = vrot.lane.b32.xlu1 %v835_v54, %s1115_s20 }
0x1571   :  { %v909_v61 = vpop.permute.xlu1 %908 }
0x1572   :  { %v911_v62 = vmul.f32 %v909_v61, %v890_v1 }
0x1574   :  { %915 = vrot.lane.b32.xlu0 %v911_v62, %s1115_s20 }
0x1575   :  { %v263_v63 = vpop.permute.xlu1 %262 }
0x1576   :  { %266 = vst.msk [vmem:[%s1633_s5 + $0x8] sm:$0xff] %vm265_vm10, %v263_v63 }
0x1578   :  { %353 = vrot.lane.b32.xlu0 %v351_v0, %s1115_s20 }
0x1579   :  { %v362_v2 = vpop.permute.xlu1 %361 }
0x157a   :  { %365 = vst.msk [vmem:[%s1633_s5 + $0x8] sm:$0xff] %vm364_vm11, %v362_v2 }
0x157c   :  { %452 = vrot.lane.b32.xlu0 %v450_v4, %s1114_s4 }
0x157d   :  { %v461_v59 = vpop.permute.xlu1 %460 }
0x157e   :  { %464 = vst.msk [vmem:[%s1633_s5 + $0x8] sm:$0xff] %vm463_vm12, %v461_v59 }
0x157f   :  { %559 = vst.msk [vmem:[%s1633_s5 + $0x8] sm:$0xff] %vm558_vm13, %v557_v5 }
0x1580   :  { %644 = vst.msk [vmem:[%s1633_s5 + $0x8] sm:$0xff] %vm257_vm9, %v643_v7  ;;  %551 = vrot.lane.b32.xlu0 %v549_v28, %s1116_s23  ;;  %vm913_vm9 = vcmp.gt.s32.totalorder %v1312_v10, %v912_v6 }
0x1581   :  { %v648_v53 = vpop.permute.xlu1 %647 }
0x1584   :  { %736 = vrot.lane.b32.xlu0 %v734_v40, %s1115_s20 }
0x1585   :  { %v743_v21 = vpop.permute.xlu1 %742 }
0x1588   :  { %831 = vrot.lane.b32.xlu0 %v829_v11, %s1114_s4 }
0x1589   :  { %v838_v18 = vpop.permute.xlu1 %837 }
0x15e6   :  { %v916_v12 = vpop.permute.xlu0 %915 }
0x15e7   :  { %v918_v14 = vsel %vm913_vm9, %v916_v12, %v1490_v38 }
0x15e8   :  { %927 = vst.msk [vmem:[%s1634_s6] sm:$0xff] %vm63_vm1, %v918_v14  ;;  %v919_v8 = vsel %vm259_vm0, %v918_v14, 0.0  ;;  %vm554_vm1 = vcmask 917248   ;;  %v925_v19 = vsel %vm255_vm8, %v918_v14, 0.0 }
0x15e9   :  { %921 = vrot.lane.b32.xlu0 %v919_v8, %s1116_s23 }
0x15ea   :  { %v354_v16 = vpop.permute.xlu0 %353 }
0x15eb   :  { %357 = vst.msk [vmem:[%s1633_s5] sm:$0xff] %vm356_vm15, %v354_v16 }
0x15ee   :  { %v453_v3 = vpop.permute.xlu0 %452 }
0x15ef   :  { %456 = vst.msk [vmem:[%s1633_s5] sm:$0xff] %vm455_vm6, %v453_v3 }
0x15f2   :  { %v552_v17 = vpop.permute.xlu0 %551 }
0x15f3   :  { %555 = vst.msk [vmem:[%s1633_s5] sm:$0xff] %vm554_vm1, %v552_v17 }
0x15f4   :  { %650 = vst.msk [vmem:[%s1633_s5] sm:$0xff] %vm265_vm10, %v648_v53 }
0x15f5   :  { %745 = vst.msk [vmem:[%s1633_s5] sm:$0xff] %vm364_vm11, %v743_v21 }
0x15f6   :  { %840 = vst.msk [vmem:[%s1633_s5] sm:$0xff] %vm463_vm12, %v838_v18  ;;  %v737_v20 = vpop.permute.xlu0 %736 }
0x15f7   :  { %926 = vst.msk [vmem:[%s1633_s5] sm:$0xff] %vm558_vm13, %v925_v19 }
0x15f8   :  { %739 = vst.msk [vmem:[%s1633_s5 + $0x8] sm:$0xff] %vm356_vm15, %v737_v20 }
0x15fa   :  { %v832_v23 = vpop.permute.xlu0 %831 }
0x15fb   :  { %834 = vst.msk [vmem:[%s1633_s5 + $0x8] sm:$0xff] %vm455_vm6, %v832_v23 }
0x165b   :  { %v922_v10 = vpop.permute.xlu0 %921 }
0x165c   :  { %924 = vst.msk [vmem:[%s1633_s5 + $0x8] sm:$0xff] %vm554_vm1, %v922_v10 }

</bundles_post_ra>
